<compile_context>
chip_gen: v7x
topology: tpu7x:2x2x1
jax: 0.10.0
libtpu: 0.0.40
codegen_flags: <defaults>
</compile_context>

<pallas_src>
import functools
import math

import jax
import jax.numpy as jnp
from jax import lax
from jax.experimental import pallas as pl
from jax.experimental.pallas import tpu as pltpu


def _round_up(x, m):
    return ((x + m - 1) // m) * m


def _cdiv(a, b):
    return (a + b - 1) // b


def _vmem_capacity_bytes():
    try:
        return int(pltpu.get_tpu_info().vmem_capacity_bytes)
    except Exception:
        return 64 << 20  # conservative default (v7x per-core VMEM)


def _choose_tile_m(mp, tile_m):
    """Largest multiple of 128 that divides mp and is <= tile_m (mp % 128 == 0)."""
    t = max(128, min(_round_up(tile_m, 128), mp))
    t = (t // 128) * 128
    while mp % t:
        t -= 128
    return t


def _gelu(h, approximate):
    if approximate:
        # tanh-based GELU: tanh goes to the EUP (its own VLIW slot), so it is
        # essentially free next to the two MXU matmuls on v6e/v7x.
        c = math.sqrt(2.0 / math.pi)
        return 0.5 * h * (1.0 + jnp.tanh(c * (h + 0.044715 * (h * h * h))))
    # exact erf-based GELU (matches torch.nn.functional.gelu default)
    return 0.5 * h * (1.0 + lax.erf(h * (1.0 / math.sqrt(2.0))))


# ----------------------------------------------------------------------------
# Kernels
# ----------------------------------------------------------------------------
def _mlp_kernel_flat(x_ref, w1_ref, b1_ref, w2_ref, b2_ref, o_ref, *, approximate):
    # fc1: (tile_n, Hp) @ (Hp, Mp) -> f32, bias + GELU in f32
    h = jnp.dot(x_ref[...], w1_ref[...], preferred_element_type=jnp.float32)
    h = _gelu(h + b1_ref[...], approximate)
    # dropout(p) in eval / deterministic forward is the identity
    # fc2: (tile_n, Mp) @ (Mp, Hp) -> f32
    out = jnp.dot(h.astype(w2_ref.dtype), w2_ref[...],
                  preferred_element_type=jnp.float32)
    o_ref[...] = (out + b2_ref[...]).astype(o_ref.dtype)


def _mlp_kernel_tiled(x_ref, w1_ref, b1_ref, w2_ref, b2_ref, o_ref, acc_ref, *,
                      approximate):
    # Grid = (row_tile, m_tile); m (mlp_dim chunks) is the innermost reduction.
    m = pl.program_id(1)

    @pl.when(m == 0)
    def _():
        acc_ref[...] = jnp.zeros_like(acc_ref)

    h = jnp.dot(x_ref[...], w1_ref[...], preferred_element_type=jnp.float32)
    h = _gelu(h + b1_ref[...], approximate)
    acc_ref[...] += jnp.dot(h.astype(w2_ref.dtype), w2_ref[...],
                            preferred_element_type=jnp.float32)

    @pl.when(m == pl.num_programs(1) - 1)
    def _():
        o_ref[...] = (acc_ref[...] + b2_ref[...]).astype(o_ref.dtype)


# ----------------------------------------------------------------------------
# Parameter preparation (hoist padding / casting out of the per-call path)
# ----------------------------------------------------------------------------
def prepare_mlp_params(w1, b1, w2, b2, *, compute_dtype=jnp.bfloat16):
    """Pad feature dims to multiples of 128 and cast weights once.

    w1: (H, M), b1: (M,), w2: (M, H), b2: (H,) with weights stored as (in, out)
    (i.e. PyTorch Linear.weight.T). Returns (w1_p, b1_p, w2_p, b2_p).
    """
    hidden, mlp_dim = w1.shape
    hp = _round_up(hidden, 128)
    mp = _round_up(mlp_dim, 128)

    if hidden == hp and mlp_dim == mp:
        w1_p = w1.astype(compute_dtype)
        w2_p = w2.astype(compute_dtype)
    else:
        w1_p = jnp.zeros((hp, mp), compute_dtype).at[:hidden, :mlp_dim].set(
            w1.astype(compute_dtype))
        w2_p = jnp.zeros((mp, hp), compute_dtype).at[:mlp_dim, :hidden].set(
            w2.astype(compute_dtype))

    if mlp_dim == mp:
        b1_p = b1.astype(jnp.float32).reshape(1, mp)
    else:
        b1_p = jnp.zeros((1, mp), jnp.float32).at[0, :mlp_dim].set(
            b1.astype(jnp.float32))
    if hidden == hp:
        b2_p = b2.astype(jnp.float32).reshape(1, hp)
    else:
        b2_p = jnp.zeros((1, hp), jnp.float32).at[0, :hidden].set(
            b2.astype(jnp.float32))
    return (w1_p, b1_p, w2_p, b2_p)


# ----------------------------------------------------------------------------
# Host-side wrapper
# ----------------------------------------------------------------------------
def mlp_pallas(x_2d, prepared_params, *, tile_n=512, tile_m=512,
               approximate_gelu=None, force_tiled=False):
    """x_2d: (N, H). prepared_params from prepare_mlp_params. Returns (N, H)."""
    w1_p, b1_p, w2_p, b2_p = prepared_params
    n, hidden = x_2d.shape
    hp, mp = w1_p.shape
    compute_dtype = w1_p.dtype
    out_dtype = x_2d.dtype
    c_item = jnp.dtype(compute_dtype).itemsize
    o_item = jnp.dtype(out_dtype).itemsize

    if approximate_gelu is None:
        # With bf16 matmul operands the quantization error already dominates the
        # tanh-vs-erf GELU difference; use the EUP-friendly tanh form. Keep exact
        # erf when computing in f32 (torch parity).
        approximate_gelu = c_item < 4

    # ---- row tiling --------------------------------------------------------
    n8 = _round_up(max(n, 1), 8)
    mxu_rows = 256  # MXU height on v6e/v7x; keep the systolic array filled
    if n8 < 2 * mxu_rows:
        # small-N / decode: pad rows up to the MXU height rather than starving
        # the MXU (padding cost is negligible); single row tile.
        tile_n_eff = min(max(n8, mxu_rows), max(_round_up(tile_n, 8), 8))
    else:
        # at least 2 row tiles so both v7x TensorCores get work
        n_tiles_target = max(2, _cdiv(n8, max(_round_up(tile_n, 8), 8)))
        tile_n_eff = _round_up(_cdiv(n8, n_tiles_target), 8)
    n_pad = _round_up(n8, tile_n_eff)
    n_tiles = n_pad // tile_n_eff

    # ---- VMEM budgets (generation-aware) -----------------------------------
    vmem_cap = _vmem_capacity_bytes()

    def _vmem_limit(estimate_bytes):
        hi = int(0.9 * vmem_cap)  # leave headroom for Mosaic internal scratch
        return int(min(max(estimate_bytes + (8 << 20), 32 << 20), hi))

    weights_resident = (2 * hp * mp) * c_item + (mp + hp) * 4   # single-buffered
    flat_stream = 2 * tile_n_eff * hp * (c_item + o_item)        # x / out tiles
    flat_live = tile_n_eff * mp * (4 + c_item)                   # fc1 f32 + bf16 cast
    flat_total = weights_resident + flat_stream + flat_live
    use_tiled = force_tiled or flat_total > int(0.7 * vmem_cap)

    # ---- pad / cast the activations (fast path when already aligned) -------
    if n_pad == n and hp == hidden:
        x_p = x_2d.astype(compute_dtype)
    else:
        x_p = jnp.zeros((n_pad, hp), compute_dtype).at[:n, :hidden].set(
            x_2d.astype(compute_dtype))

    # ---- resident-weight path ----------------------------------------------
    def call_flat(single_buffer_weights):
        wmode = {}
        wbuf = 2
        if single_buffer_weights:
            # constant index_map -> never re-fetched; one buffer is enough
            wmode = dict(pipeline_mode=pl.Buffered(1))
            wbuf = 1
        est = ((2 * hp * mp) * c_item * wbuf + (mp + hp) * 4 * wbuf
               + flat_stream + flat_live)
        grid_spec = pltpu.PrefetchScalarGridSpec(
            num_scalar_prefetch=0,
            grid=(n_tiles,),
            in_specs=[
                pl.BlockSpec((tile_n_eff, hp), lambda i: (i, 0)),        # x tile
                pl.BlockSpec((hp, mp), lambda i: (0, 0), **wmode),       # W1
                pl.BlockSpec((1, mp), lambda i: (0, 0), **wmode),        # b1
                pl.BlockSpec((mp, hp), lambda i: (0, 0), **wmode),       # W2
                pl.BlockSpec((1, hp), lambda i: (0, 0), **wmode),        # b2
            ],
            out_specs=pl.BlockSpec((tile_n_eff, hp), lambda i: (i, 0)),
        )
        cost = pl.CostEstimate(
            flops=2 * 2 * n_pad * hp * mp,
            transcendentals=n_pad * mp,
            bytes_accessed=int(x_p.nbytes + w1_p.nbytes + w2_p.nbytes
                               + b1_p.nbytes + b2_p.nbytes + n_pad * hp * o_item),
        )
        return pl.pallas_call(
            functools.partial(_mlp_kernel_flat, approximate=approximate_gelu),
            out_shape=jax.ShapeDtypeStruct((n_pad, hp), out_dtype),
            grid_spec=grid_spec,
            compiler_params=pltpu.CompilerParams(
                dimension_semantics=("parallel",),
                vmem_limit_bytes=_vmem_limit(est),
            ),
            cost_estimate=cost,
        )(x_p, w1_p, b1_p, w2_p, b2_p)

    # ---- mlp_dim-tiled path (weights streamed, f32 accumulator) -------------
    def call_tiled():
        tm = _choose_tile_m(mp, tile_m)
        m_tiles = mp // tm
        est = (2 * (2 * hp * tm) * c_item + 2 * tm * 4 + 2 * hp * 4
               + 2 * tile_n_eff * hp * (c_item + o_item)
               + tile_n_eff * hp * 4                # accumulator scratch
               + tile_n_eff * tm * (4 + c_item))    # fc1 chunk + bf16 cast
        grid_spec = pltpu.PrefetchScalarGridSpec(
            num_scalar_prefetch=0,
            grid=(n_tiles, m_tiles),
            in_specs=[
                pl.BlockSpec((tile_n_eff, hp), lambda i, m: (i, 0)),   # x tile
                pl.BlockSpec((hp, tm), lambda i, m: (0, m)),           # W1 chunk
                pl.BlockSpec((1, tm), lambda i, m: (0, m)),            # b1 chunk
                pl.BlockSpec((tm, hp), lambda i, m: (m, 0)),           # W2 chunk
                pl.BlockSpec((1, hp), lambda i, m: (0, 0)),            # b2
            ],
            out_specs=pl.BlockSpec((tile_n_eff, hp), lambda i, m: (i, 0)),
            scratch_shapes=[pltpu.VMEM((tile_n_eff, hp), jnp.float32)],
        )
        cost = pl.CostEstimate(
            flops=2 * 2 * n_pad * hp * mp,
            transcendentals=n_pad * mp,
            bytes_accessed=int(x_p.nbytes
                               + n_tiles * (w1_p.nbytes + w2_p.nbytes + b1_p.nbytes)
                               + b2_p.nbytes + n_pad * hp * o_item),
        )
        return pl.pallas_call(
            functools.partial(_mlp_kernel_tiled, approximate=approximate_gelu),
            out_shape=jax.ShapeDtypeStruct((n_pad, hp), out_dtype),
            grid_spec=grid_spec,
            compiler_params=pltpu.CompilerParams(
                dimension_semantics=("parallel", "arbitrary"),
                vmem_limit_bytes=_vmem_limit(est),
            ),
            cost_estimate=cost,
        )(x_p, w1_p, b1_p, w2_p, b2_p)

    if use_tiled:
        out_p = call_tiled()
    else:
        try:
            out_p = call_flat(True)        # single-buffered resident weights
        except Exception:
            out_p = call_flat(False)       # fallback: default double buffering

    if n_pad == n and hp == hidden:
        return out_p
    return out_p[:n, :hidden]


def mlp_forward(x, params, *, tile_n=512, tile_m=512, approximate_gelu=None,
                compute_dtype=jnp.bfloat16, force_tiled=False):
    """x: (batch, seq, hidden) -> (batch, seq, hidden).

    `params` may be raw (w1, b1, w2, b2) with weights as (in, out), or the
    output of prepare_mlp_params (preferred: prepare once and reuse).
    """
    if params[1].ndim == 1:  # raw params -> pad/cast (per-call; prefer prepare once)
        params = prepare_mlp_params(*params, compute_dtype=compute_dtype)
    b, s, h = x.shape
    y = mlp_pallas(x.reshape(b * s, h), params, tile_n=tile_n, tile_m=tile_m,
                   approximate_gelu=approximate_gelu, force_tiled=force_tiled)
    return y.reshape(b, s, h)


# ----------------------------------------------------------------------------
# Initialization + references
# ----------------------------------------------------------------------------
def xavier_uniform(key, fan_in, fan_out, dtype=jnp.float32):
    limit = math.sqrt(6.0 / (fan_in + fan_out))
    return jax.random.uniform(key, (fan_in, fan_out), dtype, -limit, limit)


def init_mlp_params(key, hidden_size, mlp_dim):
    k1, k2, k3, k4 = jax.random.split(key, 4)
    # Stored as (in, out) == PyTorch Linear.weight.T
    w1 = xavier_uniform(k1, hidden_size, mlp_dim)
    w2 = xavier_uniform(k2, mlp_dim, hidden_size)
    b1 = 1e-6 * jax.random.normal(k3, (mlp_dim,), jnp.float32)
    b2 = 1e-6 * jax.random.normal(k4, (hidden_size,), jnp.float32)
    return w1, b1, w2, b2


def mlp_reference(x, params, *, approximate, compute_dtype=jnp.bfloat16):
    """Pure-JAX reference mimicking the kernel's bf16-operand / f32-accum path."""
    w1, b1, w2, b2 = params
    h = jnp.dot(x.astype(compute_dtype), w1.astype(compute_dtype),
                preferred_element_type=jnp.float32) + b1
    h = _gelu(h, approximate)
    out = jnp.dot(h.astype(compute_dtype), w2.astype(compute_dtype),
                  preferred_element_type=jnp.float32) + b2
    return out.astype(x.dtype)


def mlp_reference_f32(x, params):
    w1, b1, w2, b2 = params
    h = jnp.dot(x, w1) + b1
    h = 0.5 * h * (1.0 + lax.erf(h / math.sqrt(2.0)))
    return jnp.dot(h, w2) + b2


if __name__ == "__main__":
    # config.hidden_size = 32, config.transformer['mlp_dim'] = 64
    batch, seq, hidden_size, mlp_dim = 2, 8, 32, 64

    key = jax.random.PRNGKey(0)
    kx, kp = jax.random.split(key)
    x = jax.random.normal(kx, (batch, seq, hidden_size), jnp.float32)
    raw_params = init_mlp_params(kp, hidden_size, mlp_dim)
    prepared = prepare_mlp_params(*raw_params)   # hoisted out of the per-call path

    # 1) default path: resident single-buffered weights, tanh GELU (bf16 compute)
    y = jax.block_until_ready(mlp_forward(x, prepared))
    assert y.shape == (batch, seq, hidden_size)
    assert jnp.allclose(y, mlp_reference(x, raw_params, approximate=True),
                        atol=1e-3, rtol=1e-3), "mismatch vs bf16 reference (tanh)"
    assert jnp.allclose(y, mlp_reference_f32(x, raw_params),
                        atol=3e-2, rtol=3e-2), "mismatch vs f32 reference"

    # 2) exact erf GELU path (bit-level torch.nn.functional.gelu parity)
    y_erf = jax.block_until_ready(mlp_forward(x, prepared, approximate_gelu=False))
    assert jnp.allclose(y_erf, mlp_reference(x, raw_params, approximate=False),
                        atol=1e-3, rtol=1e-3), "mismatch vs bf16 reference (erf)"
    assert jnp.allclose(y_erf, mlp_reference_f32(x, raw_params),
                        atol=3e-2, rtol=3e-2), "mismatch vs f32 reference (erf)"

    # 3) mlp_dim-tiled fallback (used automatically when resident weights would
    #    not fit VMEM, e.g. ViT-H on v7x); forced here at small size to exercise it.
    hidden2, mlp_dim2 = 32, 256
    kx2, kp2 = jax.random.split(jax.random.PRNGKey(0))
    x2 = jax.random.normal(kx2, (4, 16, hidden2), jnp.float32)
    raw2 = init_mlp_params(kp2, hidden2, mlp_dim2)
    prep2 = prepare_mlp_params(*raw2)
    y2 = jax.block_until_ready(
        mlp_forward(x2, prep2, force_tiled=True, tile_m=128))
    assert y2.shape == x2.shape
    assert jnp.allclose(y2, mlp_reference(x2, raw2, approximate=True),
                        atol=1e-3, rtol=1e-3), "tiled path: mismatch vs bf16 reference"
    assert jnp.allclose(y2, mlp_reference_f32(x2, raw2),
                        atol=3e-2, rtol=3e-2), "tiled path: mismatch vs f32 reference"

    # TODO(synk): training-mode dropout (stochastic masking) not implemented;
    # forward here matches eval / deterministic inference semantics.
    print("KERNEL_OK")
</pallas_src>

<mosaic_0001>
module attributes {stable_mosaic.version = 11 : i64} {
  func.func @_mlp_kernel_flat(%arg0: i32, %arg1: memref<256x128xbf16, #tpu.memory_space<vmem>>, %arg2: memref<128x128xbf16, #tpu.memory_space<vmem>>, %arg3: memref<1x128xf32, #tpu.memory_space<vmem>>, %arg4: memref<128x128xbf16, #tpu.memory_space<vmem>>, %arg5: memref<1x128xf32, #tpu.memory_space<vmem>>, %arg6: memref<256x128xf32, #tpu.memory_space<vmem>>) attributes {dimension_semantics = [#tpu.dimension_semantics<parallel>], iteration_bounds = array<i64: 1>, scalar_prefetch = 0 : i64, scratch_operands = 0 : i64, tpu.core_type = #tpu.core_type<tc>, window_params = [{transform_indices = @transform_0, window_bounds = array<i64: 256, 128>}, {pipeline_mode = #tpu.pipeline_mode<synchronous>, transform_indices = @transform_1, window_bounds = array<i64: 128, 128>}, {pipeline_mode = #tpu.pipeline_mode<synchronous>, transform_indices = @transform_2, window_bounds = array<i64: 1, 128>}, {pipeline_mode = #tpu.pipeline_mode<synchronous>, transform_indices = @transform_3, window_bounds = array<i64: 128, 128>}, {pipeline_mode = #tpu.pipeline_mode<synchronous>, transform_indices = @transform_4, window_bounds = array<i64: 1, 128>}, {transform_indices = @transform_5, window_bounds = array<i64: 256, 128>}]} {
    %c0 = arith.constant 0 : index
    %c0_0 = arith.constant 0 : index
    %0 = vector.load %arg1[%c0, %c0_0] : memref<256x128xbf16, #tpu.memory_space<vmem>>, vector<256x128xbf16>
    %c0_1 = arith.constant 0 : index
    %c0_2 = arith.constant 0 : index
    %1 = vector.load %arg2[%c0_1, %c0_2] : memref<128x128xbf16, #tpu.memory_space<vmem>>, vector<128x128xbf16>
    %cst = arith.constant dense<0.000000e+00> : vector<256x128xf32>
    %2 = tpu.matmul %0, %1, %cst {dimension_numbers = #tpu.dot_dimension_numbers<[1], [0], [0], [1], [0, 0, 1, 1], [], []>} : vector<256x128xbf16>, vector<128x128xbf16>, vector<256x128xf32> -> vector<256x128xf32>
    %c0_3 = arith.constant 0 : index
    %c0_4 = arith.constant 0 : index
    %3 = vector.load %arg3[%c0_3, %c0_4] : memref<1x128xf32, #tpu.memory_space<vmem>>, vector<1x128xf32>
    %4 = vector.broadcast %3 : vector<1x128xf32> to vector<256x128xf32>
    %5 = arith.addf %2, %4 : vector<256x128xf32>
    %cst_5 = arith.constant 5.000000e-01 : f32
    %6 = vector.broadcast %cst_5 : f32 to vector<256x128xf32>
    %7 = arith.mulf %6, %5 : vector<256x128xf32>
    %8 = arith.mulf %5, %5 : vector<256x128xf32>
    %9 = arith.mulf %8, %5 : vector<256x128xf32>
    %cst_6 = arith.constant 4.471500e-02 : f32
    %10 = vector.broadcast %cst_6 : f32 to vector<256x128xf32>
    %11 = arith.mulf %10, %9 : vector<256x128xf32>
    %12 = arith.addf %5, %11 : vector<256x128xf32>
    %cst_7 = arith.constant 0.797884583 : f32
    %13 = vector.broadcast %cst_7 : f32 to vector<256x128xf32>
    %14 = arith.mulf %13, %12 : vector<256x128xf32>
    %15 = math.tanh %14 : vector<256x128xf32>
    %cst_8 = arith.constant 1.000000e+00 : f32
    %16 = vector.broadcast %cst_8 : f32 to vector<256x128xf32>
    %17 = arith.addf %16, %15 : vector<256x128xf32>
    %18 = arith.mulf %7, %17 : vector<256x128xf32>
    %19 = arith.truncf %18 : vector<256x128xf32> to vector<256x128xbf16>
    %c0_9 = arith.constant 0 : index
    %c0_10 = arith.constant 0 : index
    %20 = vector.load %arg4[%c0_9, %c0_10] : memref<128x128xbf16, #tpu.memory_space<vmem>>, vector<128x128xbf16>
    %cst_11 = arith.constant dense<0.000000e+00> : vector<256x128xf32>
    %21 = tpu.matmul %19, %20, %cst_11 {dimension_numbers = #tpu.dot_dimension_numbers<[1], [0], [0], [1], [0, 0, 1, 1], [], []>} : vector<256x128xbf16>, vector<128x128xbf16>, vector<256x128xf32> -> vector<256x128xf32>
    %c0_12 = arith.constant 0 : index
    %c0_13 = arith.constant 0 : index
    %22 = vector.load %arg5[%c0_12, %c0_13] : memref<1x128xf32, #tpu.memory_space<vmem>>, vector<1x128xf32>
    %23 = vector.broadcast %22 : vector<1x128xf32> to vector<256x128xf32>
    %24 = arith.addf %21, %23 : vector<256x128xf32>
    %c0_14 = arith.constant 0 : index
    %c0_15 = arith.constant 0 : index
    %25 = vector.load %arg6[%c0_14, %c0_15] : memref<256x128xf32, #tpu.memory_space<vmem>>, vector<256x128xf32>
    tpu.vector_store %arg6[%c0_14, %c0_15], %24 {strides = array<i32>} : memref<256x128xf32, #tpu.memory_space<vmem>>, vector<256x128xf32>,
    return
  }
  func.func @transform_0(%arg0: i32) -> (i32, i32) {
    %c0_i32 = arith.constant 0 : i32
    %c0_i32_0 = arith.constant 0 : i32
    return %arg0, %c0_i32 : i32, i32
  }
  func.func @transform_1(%arg0: i32) -> (i32, i32) {
    %c0_i32 = arith.constant 0 : i32
    %c0_i32_0 = arith.constant 0 : i32
    %c0_i32_1 = arith.constant 0 : i32
    return %c0_i32, %c0_i32_0 : i32, i32
  }
  func.func @transform_2(%arg0: i32) -> (i32, i32) {
    %c0_i32 = arith.constant 0 : i32
    %c0_i32_0 = arith.constant 0 : i32
    %c0_i32_1 = arith.constant 0 : i32
    return %c0_i32, %c0_i32_0 : i32, i32
  }
  func.func @transform_3(%arg0: i32) -> (i32, i32) {
    %c0_i32 = arith.constant 0 : i32
    %c0_i32_0 = arith.constant 0 : i32
    %c0_i32_1 = arith.constant 0 : i32
    return %c0_i32, %c0_i32_0 : i32, i32
  }
  func.func @transform_4(%arg0: i32) -> (i32, i32) {
    %c0_i32 = arith.constant 0 : i32
    %c0_i32_0 = arith.constant 0 : i32
    %c0_i32_1 = arith.constant 0 : i32
    return %c0_i32, %c0_i32_0 : i32, i32
  }
  func.func @transform_5(%arg0: i32) -> (i32, i32) {
    %c0_i32 = arith.constant 0 : i32
    %c0_i32_0 = arith.constant 0 : i32
    return %arg0, %c0_i32 : i32, i32
  }
}

module attributes {stable_mosaic.version = 11 : i64} {
  func.func @_mlp_kernel_flat(%arg0: i32, %arg1: memref<256x128xbf16, #tpu.memory_space<vmem>>, %arg2: memref<128x128xbf16, #tpu.memory_space<vmem>>, %arg3: memref<1x128xf32, #tpu.memory_space<vmem>>, %arg4: memref<128x128xbf16, #tpu.memory_space<vmem>>, %arg5: memref<1x128xf32, #tpu.memory_space<vmem>>, %arg6: memref<256x128xf32, #tpu.memory_space<vmem>>) attributes {dimension_semantics = [#tpu.dimension_semantics<parallel>], iteration_bounds = array<i64: 1>, scalar_prefetch = 0 : i64, scratch_operands = 0 : i64, tpu.core_type = #tpu.core_type<tc>, window_params = [{transform_indices = @transform_0, window_bounds = array<i64: 256, 128>}, {pipeline_mode = #tpu.pipeline_mode<synchronous>, transform_indices = @transform_1, window_bounds = array<i64: 128, 128>}, {pipeline_mode = #tpu.pipeline_mode<synchronous>, transform_indices = @transform_2, window_bounds = array<i64: 1, 128>}, {pipeline_mode = #tpu.pipeline_mode<synchronous>, transform_indices = @transform_3, window_bounds = array<i64: 128, 128>}, {pipeline_mode = #tpu.pipeline_mode<synchronous>, transform_indices = @transform_4, window_bounds = array<i64: 1, 128>}, {transform_indices = @transform_5, window_bounds = array<i64: 256, 128>}]} {
    %c0 = arith.constant 0 : index
    %c0_0 = arith.constant 0 : index
    %0 = vector.load %arg1[%c0, %c0_0] : memref<256x128xbf16, #tpu.memory_space<vmem>>, vector<256x128xbf16>
    %c0_1 = arith.constant 0 : index
    %c0_2 = arith.constant 0 : index
    %1 = vector.load %arg2[%c0_1, %c0_2] : memref<128x128xbf16, #tpu.memory_space<vmem>>, vector<128x128xbf16>
    %cst = arith.constant dense<0.000000e+00> : vector<256x128xf32>
    %2 = tpu.matmul %0, %1, %cst {dimension_numbers = #tpu.dot_dimension_numbers<[1], [0], [0], [1], [0, 0, 1, 1], [], []>} : vector<256x128xbf16>, vector<128x128xbf16>, vector<256x128xf32> -> vector<256x128xf32>
    %c0_3 = arith.constant 0 : index
    %c0_4 = arith.constant 0 : index
    %3 = vector.load %arg3[%c0_3, %c0_4] : memref<1x128xf32, #tpu.memory_space<vmem>>, vector<1x128xf32>
    %4 = vector.broadcast %3 : vector<1x128xf32> to vector<256x128xf32>
    %5 = arith.addf %2, %4 : vector<256x128xf32>
    %cst_5 = arith.constant 5.000000e-01 : f32
    %6 = vector.broadcast %cst_5 : f32 to vector<256x128xf32>
    %7 = arith.mulf %6, %5 : vector<256x128xf32>
    %8 = arith.mulf %5, %5 : vector<256x128xf32>
    %9 = arith.mulf %8, %5 : vector<256x128xf32>
    %cst_6 = arith.constant 4.471500e-02 : f32
    %10 = vector.broadcast %cst_6 : f32 to vector<256x128xf32>
    %11 = arith.mulf %10, %9 : vector<256x128xf32>
    %12 = arith.addf %5, %11 : vector<256x128xf32>
    %cst_7 = arith.constant 0.797884583 : f32
    %13 = vector.broadcast %cst_7 : f32 to vector<256x128xf32>
    %14 = arith.mulf %13, %12 : vector<256x128xf32>
    %15 = math.tanh %14 : vector<256x128xf32>
    %cst_8 = arith.constant 1.000000e+00 : f32
    %16 = vector.broadcast %cst_8 : f32 to vector<256x128xf32>
    %17 = arith.addf %16, %15 : vector<256x128xf32>
    %18 = arith.mulf %7, %17 : vector<256x128xf32>
    %19 = arith.truncf %18 : vector<256x128xf32> to vector<256x128xbf16>
    %c0_9 = arith.constant 0 : index
    %c0_10 = arith.constant 0 : index
    %20 = vector.load %arg4[%c0_9, %c0_10] : memref<128x128xbf16, #tpu.memory_space<vmem>>, vector<128x128xbf16>
    %cst_11 = arith.constant dense<0.000000e+00> : vector<256x128xf32>
    %21 = tpu.matmul %19, %20, %cst_11 {dimension_numbers = #tpu.dot_dimension_numbers<[1], [0], [0], [1], [0, 0, 1, 1], [], []>} : vector<256x128xbf16>, vector<128x128xbf16>, vector<256x128xf32> -> vector<256x128xf32>
    %c0_12 = arith.constant 0 : index
    %c0_13 = arith.constant 0 : index
    %22 = vector.load %arg5[%c0_12, %c0_13] : memref<1x128xf32, #tpu.memory_space<vmem>>, vector<1x128xf32>
    %23 = vector.broadcast %22 : vector<1x128xf32> to vector<256x128xf32>
    %24 = arith.addf %21, %23 : vector<256x128xf32>
    %c0_14 = arith.constant 0 : index
    %c0_15 = arith.constant 0 : index
    %25 = vector.load %arg6[%c0_14, %c0_15] : memref<256x128xf32, #tpu.memory_space<vmem>>, vector<256x128xf32>
    tpu.vector_store %arg6[%c0_14, %c0_15], %24 {strides = array<i32>} : memref<256x128xf32, #tpu.memory_space<vmem>>, vector<256x128xf32>,
    return
  }
  func.func @transform_0(%arg0: i32) -> (i32, i32) {
    %c0_i32 = arith.constant 0 : i32
    %c0_i32_0 = arith.constant 0 : i32
    return %arg0, %c0_i32 : i32, i32
  }
  func.func @transform_1(%arg0: i32) -> (i32, i32) {
    %c0_i32 = arith.constant 0 : i32
    %c0_i32_0 = arith.constant 0 : i32
    %c0_i32_1 = arith.constant 0 : i32
    return %c0_i32, %c0_i32_0 : i32, i32
  }
  func.func @transform_2(%arg0: i32) -> (i32, i32) {
    %c0_i32 = arith.constant 0 : i32
    %c0_i32_0 = arith.constant 0 : i32
    %c0_i32_1 = arith.constant 0 : i32
    return %c0_i32, %c0_i32_0 : i32, i32
  }
  func.func @transform_3(%arg0: i32) -> (i32, i32) {
    %c0_i32 = arith.constant 0 : i32
    %c0_i32_0 = arith.constant 0 : i32
    %c0_i32_1 = arith.constant 0 : i32
    return %c0_i32, %c0_i32_0 : i32, i32
  }
  func.func @transform_4(%arg0: i32) -> (i32, i32) {
    %c0_i32 = arith.constant 0 : i32
    %c0_i32_0 = arith.constant 0 : i32
    %c0_i32_1 = arith.constant 0 : i32
    return %c0_i32, %c0_i32_0 : i32, i32
  }
  func.func @transform_5(%arg0: i32) -> (i32, i32) {
    %c0_i32 = arith.constant 0 : i32
    %c0_i32_0 = arith.constant 0 : i32
    return %arg0, %c0_i32 : i32, i32
  }
}

</mosaic_0001>

<bundles_post_ra>
// kernel: tpu_custom_call.1
= control target key start
LH: loop header
LB: loop body
LE: loop exit
PB: predicated region body
PF: predicated region fallthrough
CT: control target
= control target key end

     0   :  { %10 = vsyncpa [#allocation3], 0  ;;  %s1791_s0 = inlined_call_operand.hbm [shape: bf16[256,128], index: 0, kind: input, shape index: {}]   ;;  %s1792_s1 = inlined_call_operand.hbm [shape: bf16[128,128], index: 1, kind: input, shape index: {}]   ;;  %s1793_s2 = inlined_call_operand.vmem [shape: f32[1,128], index: 2, kind: input, shape index: {}]   ;;  %s1794_s3 = inlined_call_operand.hbm [shape: bf16[128,128], index: 3, kind: input, shape index: {}]   ;;  %s1795_s4 = inlined_call_operand.vmem [shape: f32[1,128], index: 4, kind: input, shape index: {}]   ;;  %s1796_s5 = inlined_call_operand.hbm [shape: f32[256,128], index: 5, kind: output, shape index: {}]  }
   0x1   :  { %11 = vsyncpa [#allocation6], 0 }
   0x2   :  { %12 = vsyncpa [#allocation4], 0  ;;  %s1385_s18 = smov [#allocation5]   ;;  %s1386_s20 = smov [#allocation2]  }
   0x3   :  { %s30_s19 = sshll.u32 %s1385_s18, 4  ;;  %s18_s21 = sshll.u32 %s1386_s20, 4  ;;  %s31_s19 = int_to_ptr.vmem [resolvable:$true] %s30_s19  ;;  %s1423_s21 = int_to_ptr.vmem [resolvable:$true] %s18_s21 }
   0x4   :  { %s1291_s24 = scalar_lea.hbm %s1792_s1, 1024 }
   0x5   :  { %p1292_p0 = scmp.ne.s32.totalorder %s1792_s1, %s1291_s24  ;;  %p1295_p1 = scmp.lt.u32.totalorder %s1291_s24, %s1792_s1 }
   0x7   :  { %p1297_p2 = pnand %p1295_p1, %p1292_p0 }
   0x9   :  { %1300 = shalt.err (!%p1297_p2)
}
   0xa   :  { %s1301_s29 = scalar_lea.vmem %s31_s19, 1024  ;;  %p1306_p4 = scmp.lt.s32.totalorder %s31_s19, %s31_s19 }
   0xb   :  { %p1302_p3 = scmp.ne.s32.totalorder %s31_s19, %s1301_s29  ;;  %p1307_p5 = scmp.lt.s32.totalorder %s1301_s29, %s1301_s29 }
   0xd   :  { %p1308_p6 = por %p1307_p5, %p1306_p4 }
   0xf   :  { %p1309_p7 = pnand %p1308_p6, %p1302_p3 }
  0x11   :  { %1312 = shalt.err (!%p1309_p7)
}
  0x12   :  { %s1387_s30 = smov 64   ;;  %s1388_s6 = smov 4  }
  0x13   :  { %36 = dma.hbm_to_vmem [thread:$0]  %s1792_s1, 1024, %s31_s19, [#allocation6], %s1387_s30, %s1387_s30, %s1388_s6  }
  0x14   :  { %s1313_s11 = scalar_lea.hbm %s1791_s0, 2048 }
  0x15   :  { %p1314_p8 = scmp.ne.s32.totalorder %s1791_s0, %s1313_s11  ;;  %p1317_p9 = scmp.lt.u32.totalorder %s1313_s11, %s1791_s0 }
  0x17   :  { %p1319_p10 = pnand %p1317_p9, %p1314_p8 }
  0x19   :  { %1322 = shalt.err (!%p1319_p10)
}
  0x1a   :  { %s1323_s16 = scalar_lea.vmem %s1423_s21, 2048  ;;  %p1328_p12 = scmp.lt.s32.totalorder %s1423_s21, %s1423_s21 }
  0x1b   :  { %p1324_p11 = scmp.ne.s32.totalorder %s1423_s21, %s1323_s16  ;;  %p1329_p13 = scmp.lt.s32.totalorder %s1323_s16, %s1323_s16 }
  0x1d   :  { %p1330_p0 = por %p1329_p13, %p1328_p12 }
  0x1f   :  { %p1331_p1 = pnand %p1330_p0, %p1324_p11 }
  0x21   :  { %1334 = shalt.err (!%p1331_p1)
}
  0x22   :  { %24 = dma.hbm_to_vmem [thread:$0]  %s1791_s0, 2048, %s1423_s21, [#allocation3], %s1387_s30, %s1387_s30, %s1388_s6  }
  0x23   :  { %s1389_s18 = smov [#allocation7]   ;;  %s1335_s23 = scalar_lea.hbm %s1794_s3, 1024 }
  0x24   :  { %s44_s19 = sshll.u32 %s1389_s18, 4  ;;  %p1336_p2 = scmp.ne.s32.totalorder %s1794_s3, %s1335_s23  ;;  %s45_s19 = int_to_ptr.vmem [resolvable:$true] %s44_s19 }
  0x25   :  { %p1339_p3 = scmp.lt.u32.totalorder %s1335_s23, %s1794_s3 }
  0x27   :  { %p1341_p4 = pnand %p1339_p3, %p1336_p2 }
  0x29   :  { %1344 = shalt.err (!%p1341_p4)
}
  0x2a   :  { %s1345_s28 = scalar_lea.vmem %s45_s19, 1024  ;;  %p1350_p6 = scmp.lt.s32.totalorder %s45_s19, %s45_s19 }
  0x2b   :  { %p1346_p5 = scmp.ne.s32.totalorder %s45_s19, %s1345_s28  ;;  %p1351_p7 = scmp.lt.s32.totalorder %s1345_s28, %s1345_s28 }
  0x2d   :  { %p1352_p8 = por %p1351_p7, %p1350_p6 }
  0x2f   :  { %p1353_p9 = pnand %p1352_p8, %p1346_p5 }
  0x31   :  { %1356 = shalt.err (!%p1353_p9)
}
  0x32   :  { %50 = dma.hbm_to_vmem [thread:$0]  %s1794_s3, 1024, %s45_s19, [#allocation6], %s1387_s30, %s1387_s30, %s1388_s6  }
  0x33   :  { %1379 = dma.done.wait [#allocation3], 2048  }
  0x34   :  { %1380 = vsyncadd [#allocation3], 4294965248 }
  0x35   :  { %1381 = dma.done.wait [#allocation6], 2048  }
  0x36   :  { %1382 = vsyncadd [#allocation6], 4294965248  ;;  %v1195_v0 = vld [vmem:[#allocation5] sm:$0xff]   ;;  %v1196_v1 = vld [vmem:[#allocation5 + $0x8] sm:$0xff]  }
  0x37   :  { %1091 = vmatprep.subr.bf16.mxu0 %v1195_v0  ;;  %v1197_v2 = vld [vmem:[#allocation5 + $0x10] sm:$0xff]   ;;  %v1198_v3 = vld [vmem:[#allocation5 + $0x18] sm:$0xff]   ;;  %v1203_v4 = vld [vmem:[#allocation2] sm:$0xff]  }
  0x38   :  { %1092 = vmatpush3.bf16.msra.mxu0 %v1195_v0  ;;  %1107 = vmatprep.mubr.bf16.mxu0 %v1203_v4  ;;  %v1199_v5 = vld [vmem:[#allocation5 + $0x20] sm:$0xff]   ;;  %v1200_v6 = vld [vmem:[#allocation5 + $0x28] sm:$0xff]   ;;  %v1201_v7 = vld [vmem:[#allocation5 + $0x30] sm:$0xff]  }
  0x39   :  { %1093 = vmatprep.subr.bf16.mxu0 %v1196_v1  ;;  %v1202_v8 = vld [vmem:[#allocation5 + $0x38] sm:$0xff]   ;;  %v1204_v9 = vld [vmem:[#allocation2 + $0x8] sm:$0xff]   ;;  %v1205_v10 = vld [vmem:[#allocation2 + $0x10] sm:$0xff]  }
  0x3a   :  { %v1206_v11 = vld [vmem:[#allocation2 + $0x18] sm:$0xff]   ;;  %v1207_v12 = vld [vmem:[#allocation2 + $0x20] sm:$0xff]   ;;  %v1208_v13 = vld [vmem:[#allocation2 + $0x28] sm:$0xff]  }
  0x3b   :  { %v1209_v14 = vld [vmem:[#allocation2 + $0x30] sm:$0xff]   ;;  %v1210_v15 = vld [vmem:[#allocation2 + $0x38] sm:$0xff]   ;;  %v1211_v16 = vld [vmem:[#allocation2 + $0x40] sm:$0xff]  }
  0x3c   :  { %1094 = vmatpush3.bf16.msra.mxu0 %v1196_v1  ;;  %v1212_v17 = vld [vmem:[#allocation2 + $0x48] sm:$0xff]   ;;  %v1213_v18 = vld [vmem:[#allocation2 + $0x50] sm:$0xff]   ;;  %v1214_v19 = vld [vmem:[#allocation2 + $0x58] sm:$0xff]  }
  0x3d   :  { %1095 = vmatprep.subr.bf16.mxu0 %v1197_v2  ;;  %v1215_v20 = vld [vmem:[#allocation2 + $0x60] sm:$0xff]   ;;  %v1216_v21 = vld [vmem:[#allocation2 + $0x68] sm:$0xff]   ;;  %v1217_v22 = vld [vmem:[#allocation2 + $0x70] sm:$0xff]  }
  0x3e   :  { %v1218_v23 = vld [vmem:[#allocation2 + $0x78] sm:$0xff]   ;;  %v1219_v24 = vld [vmem:[#allocation7] sm:$0xff]   ;;  %v1220_v25 = vld [vmem:[#allocation7 + $0x8] sm:$0xff]  }
  0x3f   :  { %1139 = vmatprep.subr.bf16.mxu1 %v1219_v24  ;;  %v1221_v26 = vld [vmem:[#allocation7 + $0x10] sm:$0xff]   ;;  %v1222_v27 = vld [vmem:[#allocation7 + $0x18] sm:$0xff]   ;;  %v1223_v28 = vld [vmem:[#allocation7 + $0x20] sm:$0xff]  }
  0x40   :  { %1096 = vmatpush3.bf16.msra.mxu0 %v1197_v2  ;;  %1140 = vmatpush3.bf16.msra.mxu1 %v1219_v24  ;;  %v1224_v29 = vld [vmem:[#allocation7 + $0x28] sm:$0xff]   ;;  %v1225_v30 = vld [vmem:[#allocation7 + $0x30] sm:$0xff]   ;;  %v1226_v31 = vld [vmem:[#allocation7 + $0x38] sm:$0xff]  }
  0x41   :  { %1097 = vmatprep.subr.bf16.mxu0 %v1198_v3  ;;  %1141 = vmatprep.subr.bf16.mxu1 %v1220_v25  ;;  %v1478_v32 = vld [vmem:[%s1793_s2] ss:$0 sm:$0xff] }
  0x44   :  { %1098 = vmatpush3.bf16.msra.mxu0 %v1198_v3  ;;  %1142 = vmatpush3.bf16.msra.mxu1 %v1220_v25 }
  0x45   :  { %1099 = vmatprep.subr.bf16.mxu0 %v1199_v5  ;;  %1143 = vmatprep.subr.bf16.mxu1 %v1221_v26 }
  0x48   :  { %1100 = vmatpush3.bf16.msra.mxu0 %v1199_v5  ;;  %1144 = vmatpush3.bf16.msra.mxu1 %v1221_v26 }
  0x49   :  { %1101 = vmatprep.subr.bf16.mxu0 %v1200_v6  ;;  %1145 = vmatprep.subr.bf16.mxu1 %v1222_v27 }
  0x4c   :  { %1102 = vmatpush3.bf16.msra.mxu0 %v1200_v6  ;;  %1146 = vmatpush3.bf16.msra.mxu1 %v1222_v27 }
  0x4d   :  { %1103 = vmatprep.subr.bf16.mxu0 %v1201_v7  ;;  %1147 = vmatprep.subr.bf16.mxu1 %v1223_v28 }
  0x50   :  { %1104 = vmatpush3.bf16.msra.mxu0 %v1201_v7  ;;  %1148 = vmatpush3.bf16.msra.mxu1 %v1223_v28 }
  0x51   :  { %1105 = vmatprep.subr.bf16.mxu0 %v1202_v8  ;;  %1149 = vmatprep.subr.bf16.mxu1 %v1224_v29 }
  0x54   :  { %1106 = vmatpush3.bf16.msra.mxu0 %v1202_v8  ;;  %1150 = vmatpush3.bf16.msra.mxu1 %v1224_v29 }
  0x55   :  { %1151 = vmatprep.subr.bf16.mxu1 %v1225_v30 }
  0x57   :  { %1108 = vmatmul.mubr.bf16.vlgmr.msra.gmra.mrb[0].mxu0 %v1204_v9 }
  0x58   :  { %1111 = vmatprep.mubr.bf16.mxu0 %v1205_v10  ;;  %1152 = vmatpush3.bf16.msra.mxu1 %v1225_v30 }
  0x59   :  { %1153 = vmatprep.subr.bf16.mxu1 %v1226_v31 }
  0x5c   :  { %1154 = vmatpush3.bf16.msra.mxu1 %v1226_v31 }
  0x5f   :  { %1112 = vmatmul.mubr.bf16.gmra.mrb[4].mxu0 %v1206_v11 }
  0x60   :  { %1115 = vmatprep.mubr.bf16.mxu0 %v1207_v12 }
  0x67   :  { %1116 = vmatmul.mubr.bf16.gmra.mrb[8].mxu0 %v1208_v13 }
  0x68   :  { %1119 = vmatprep.mubr.bf16.mxu0 %v1209_v14 }
  0x6f   :  { %1120 = vmatmul.mubr.bf16.gmra.mrb[12].mxu0 %v1210_v15 }
  0x70   :  { %1123 = vmatprep.mubr.bf16.mxu0 %v1211_v16 }
  0x77   :  { %1124 = vmatmul.mubr.bf16.gmra.mrb[16].mxu0 %v1212_v17 }
  0x78   :  { %1127 = vmatprep.mubr.bf16.mxu0 %v1213_v18 }
  0x7f   :  { %1128 = vmatmul.mubr.bf16.gmra.mrb[20].mxu0 %v1214_v19 }
  0x80   :  { %1131 = vmatprep.mubr.bf16.mxu0 %v1215_v20 }
  0x87   :  { %1132 = vmatmul.mubr.bf16.gmra.mrb[24].mxu0 %v1216_v21 }
  0x88   :  { %1135 = vmatprep.mubr.bf16.mxu0 %v1217_v22 }
  0x8f   :  { %1136 = vmatmul.mubr.bf16.gmra.mrb[28].mxu0 %v1218_v23 }
 0x12a   :  { %v1109_v33 = vpop.f32.mrb[0].mxu0 }
 0x12b   :  { %v305_v34 = vadd.f32 %v1109_v33, %v1478_v32  ;;  %v296_v35 = vpop.f32.mrb[1].mxu0 }
 0x12c   :  { %v297_v36 = vadd.f32 %v1478_v32, %v296_v35  ;;  %v1110_v37 = vpop.f32.mrb[2].mxu0 }
 0x12d   :  { %v457_v38 = vmul.f32 %v305_v34, %v305_v34  ;;  %v308_v39 = vadd.f32 %v1110_v37, %v1478_v32  ;;  %v299_v40 = vpop.f32.mrb[3].mxu0  ;;  %v1486_v53 = vmul.f32 0.5, %v305_v34 }
 0x12e   :  { %v455_v41 = vmul.f32 %v297_v36, %v297_v36  ;;  %v300_v42 = vadd.f32 %v1478_v32, %v299_v40  ;;  %v1484_v52 = vmul.f32 0.5, %v297_v36 }
 0x12f   :  { %v489_v43 = vmul.f32 %v457_v38, %v305_v34  ;;  %v458_v44 = vmul.f32 %v308_v39, %v308_v39  ;;  %v1489_v58 = vmul.f32 0.5, %v308_v39 }
 0x130   :  { %v487_v45 = vmul.f32 %v455_v41, %v297_v36  ;;  %v456_v46 = vmul.f32 %v300_v42, %v300_v42  ;;  %v1492_v62 = vmul.f32 0.5, %v300_v42 }
 0x131   :  { %v521_v47 = vmul.f32 0.044715, %v489_v43  ;;  %v490_v48 = vmul.f32 %v458_v44, %v308_v39 }
 0x132   :  { %v519_v49 = vmul.f32 0.044715, %v487_v45  ;;  %v488_v50 = vmul.f32 %v456_v46, %v300_v42  ;;  %v1113_v51 = vpop.f32.mrb[4].mxu0 }
 0x133   :  { %v553_v54 = vadd.f32 %v521_v47, %v305_v34  ;;  %v522_v55 = vmul.f32 0.044715, %v490_v48  ;;  %v321_v56 = vadd.f32 %v1113_v51, %v1478_v32  ;;  %v312_v57 = vpop.f32.mrb[5].mxu0 }
 0x134   :  { %v520_v59 = vmul.f32 0.044715, %v488_v50  ;;  %v313_v60 = vadd.f32 %v1478_v32, %v312_v57  ;;  %v1114_v61 = vpop.f32.mrb[6].mxu0  ;;  %v551_v63 = vadd.f32 %v519_v49, %v297_v36 }
 0x135   :  { %v585_v0 = vmul.f32 0.7978846, %v553_v54  ;;  %v554_v1 = vadd.f32 %v522_v55, %v308_v39  ;;  %v461_v2 = vmul.f32 %v321_v56, %v321_v56  ;;  %v324_v3 = vadd.f32 %v1114_v61, %v1478_v32  ;;  %v315_v4 = vpop.f32.mrb[7].mxu0 }
 0x136   :  { %v459_v5 = vmul.f32 %v313_v60, %v313_v60  ;;  %v316_v6 = vadd.f32 %v1478_v32, %v315_v4  ;;  %v552_v7 = vadd.f32 %v520_v59, %v300_v42  ;;  %v583_v8 = vmul.f32 0.7978846, %v551_v63 }
 0x137   :  { %1227 = vtanh.f32 %v585_v0  ;;  %v586_v9 = vmul.f32 0.7978846, %v554_v1  ;;  %v493_v10 = vmul.f32 %v461_v2, %v321_v56  ;;  %v462_v11 = vmul.f32 %v324_v3, %v324_v3 }
 0x138   :  { %v491_v12 = vmul.f32 %v459_v5, %v313_v60  ;;  %v460_v13 = vmul.f32 %v316_v6, %v316_v6  ;;  %v584_v14 = vmul.f32 0.7978846, %v552_v7  ;;  %1229 = vtanh.f32 %v583_v8 }
 0x139   :  { %1231 = vtanh.f32 %v586_v9  ;;  %v525_v15 = vmul.f32 0.044715, %v493_v10  ;;  %v494_v16 = vmul.f32 %v462_v11, %v324_v3  ;;  %v1496_v17 = vmul.f32 0.5, %v313_v60 }
 0x13a   :  { %v523_v18 = vmul.f32 0.044715, %v491_v12  ;;  %v492_v19 = vmul.f32 %v460_v13, %v316_v6  ;;  %v1117_v20 = vpop.f32.mrb[8].mxu0  ;;  %1233 = vtanh.f32 %v584_v14  ;;  %v1498_v21 = vmul.f32 0.5, %v316_v6 }
 0x13b   :  { %v557_v22 = vadd.f32 %v525_v15, %v321_v56  ;;  %v526_v23 = vmul.f32 0.044715, %v494_v16  ;;  %v1501_v24 = vadd.f32 %v1117_v20, %v1478_v32  ;;  %v328_v25 = vpop.f32.mrb[9].mxu0  ;;  %v1503_v26 = vmul.f32 0.5, %v321_v56 }
 0x13c   :  { %v555_v27 = vadd.f32 %v523_v18, %v313_v60  ;;  %v524_v28 = vmul.f32 0.044715, %v492_v19  ;;  %v329_v29 = vadd.f32 %v1478_v32, %v328_v25  ;;  %v1118_v30 = vpop.f32.mrb[10].mxu0  ;;  %v1506_v31 = vmul.f32 0.5, %v324_v3 }
 0x13d   :  { %v589_v33 = vmul.f32 0.7978846, %v557_v22  ;;  %v558_v34 = vadd.f32 %v526_v23, %v324_v3  ;;  %v465_v35 = vmul.f32 %v1501_v24, %v1501_v24  ;;  %v1511_v36 = vadd.f32 %v1118_v30, %v1478_v32  ;;  %v331_v37 = vpop.f32.mrb[11].mxu0 }
 0x13e   :  { %v587_v38 = vmul.f32 0.7978846, %v555_v27  ;;  %v556_v39 = vadd.f32 %v524_v28, %v316_v6  ;;  %v463_v40 = vmul.f32 %v329_v29, %v329_v29  ;;  %v1514_v41 = vadd.f32 %v1478_v32, %v331_v37 }
 0x13f   :  { %1235 = vtanh.f32 %v589_v33  ;;  %v590_v42 = vmul.f32 0.7978846, %v558_v34  ;;  %v497_v43 = vmul.f32 %v465_v35, %v1501_v24  ;;  %v466_v44 = vmul.f32 %v1511_v36, %v1511_v36 }
 0x140   :  { %1237 = vtanh.f32 %v587_v38  ;;  %v588_v45 = vmul.f32 0.7978846, %v556_v39  ;;  %v495_v46 = vmul.f32 %v463_v40, %v329_v29  ;;  %v464_v47 = vmul.f32 %v1514_v41, %v1514_v41 }
 0x141   :  { %v1228_v48 = vpop.eup %1227  ;;  %1239 = vtanh.f32 %v590_v42  ;;  %v529_v49 = vmul.f32 0.044715, %v497_v43  ;;  %v498_v50 = vmul.f32 %v466_v44, %v1511_v36  ;;  %v1522_v51 = vmul.f32 0.5, %v329_v29 }
 0x142   :  { %v1230_v54 = vpop.eup %1229  ;;  %1241 = vtanh.f32 %v588_v45  ;;  %v527_v55 = vmul.f32 0.044715, %v495_v46  ;;  %v496_v56 = vmul.f32 %v464_v47, %v1514_v41  ;;  %v1121_v57 = vpop.f32.mrb[12].mxu0  ;;  %v649_v59 = vadd.f32 1.0, %v1228_v48 }
 0x143   :  { %v1232_v60 = vpop.eup %1231  ;;  %v561_v61 = vadd.f32 %v529_v49, %v1501_v24  ;;  %v530_v63 = vmul.f32 0.044715, %v498_v50  ;;  %v1527_v0 = vadd.f32 %v1121_v57, %v1478_v32  ;;  %v344_v1 = vpop.f32.mrb[13].mxu0  ;;  %v647_v2 = vadd.f32 1.0, %v1230_v54 }
 0x144   :  { %v1234_v3 = vpop.eup %1233  ;;  %v559_v4 = vadd.f32 %v527_v55, %v329_v29  ;;  %v528_v5 = vmul.f32 0.044715, %v496_v56  ;;  %v1530_v6 = vadd.f32 %v1478_v32, %v344_v1  ;;  %v1122_v7 = vpop.f32.mrb[14].mxu0  ;;  %v650_v8 = vadd.f32 1.0, %v1232_v60 }
 0x145   :  { %v593_v9 = vmul.f32 0.7978846, %v561_v61  ;;  %v562_v10 = vadd.f32 %v530_v63, %v1511_v36  ;;  %v469_v11 = vmul.f32 %v1527_v0, %v1527_v0  ;;  %v1536_v12 = vadd.f32 %v1122_v7, %v1478_v32  ;;  %v347_v13 = vpop.f32.mrb[15].mxu0 }
 0x146   :  { %v591_v14 = vmul.f32 0.7978846, %v559_v4  ;;  %v560_v15 = vadd.f32 %v528_v5, %v1514_v41  ;;  %v467_v16 = vmul.f32 %v1530_v6, %v1530_v6  ;;  %v1542_v18 = vadd.f32 %v1478_v32, %v347_v13 }
 0x147   :  { %1243 = vtanh.f32 %v593_v9  ;;  %v594_v19 = vmul.f32 0.7978846, %v562_v10  ;;  %v501_v20 = vmul.f32 %v469_v11, %v1527_v0  ;;  %v470_v22 = vmul.f32 %v1536_v12, %v1536_v12 }
 0x148   :  { %1245 = vtanh.f32 %v591_v14  ;;  %v592_v23 = vmul.f32 0.7978846, %v560_v15  ;;  %v499_v25 = vmul.f32 %v467_v16, %v1530_v6  ;;  %v468_v27 = vmul.f32 %v1542_v18, %v1542_v18 }
 0x149   :  { %v1550_v28 = vpop.eup %1235  ;;  %1247 = vtanh.f32 %v594_v19  ;;  %v533_v29 = vmul.f32 0.044715, %v501_v20  ;;  %v502_v30 = vmul.f32 %v470_v22, %v1536_v12  ;;  %v648_v33 = vadd.f32 1.0, %v1234_v3 }
 0x14a   :  { %v1238_v34 = vpop.eup %1237  ;;  %1249 = vtanh.f32 %v592_v23  ;;  %v531_v35 = vmul.f32 0.044715, %v499_v25  ;;  %v500_v37 = vmul.f32 %v468_v27, %v1542_v18  ;;  %v1125_v38 = vpop.f32.mrb[16].mxu0  ;;  %v679_v39 = vmul.f32 %v647_v2, %v1484_v52 }
 0x14b   :  { %v1555_v40 = vpop.eup %1239  ;;  %v565_v42 = vadd.f32 %v533_v29, %v1527_v0  ;;  %v534_v43 = vmul.f32 0.044715, %v502_v30  ;;  %v1559_v44 = vadd.f32 %v1125_v38, %v1478_v32  ;;  %v360_v45 = vpop.f32.mrb[17].mxu0  ;;  %v680_v46 = vmul.f32 %v648_v33, %v1492_v62 }
 0x14c   :  { %v1242_v47 = vpop.eup %1241  ;;  %v563_v48 = vadd.f32 %v531_v35, %v1530_v6  ;;  %v532_v49 = vmul.f32 0.044715, %v500_v37  ;;  %v1564_v50 = vadd.f32 %v1478_v32, %v360_v45  ;;  %v1126_v54 = vpop.f32.mrb[18].mxu0  ;;  %v681_v52 = vmul.f32 %v649_v59, %v1486_v53 }
 0x14d   :  { %v597_v55 = vmul.f32 0.7978846, %v565_v42  ;;  %v566_v56 = vadd.f32 %v534_v43, %v1536_v12  ;;  %v473_v57 = vmul.f32 %v1559_v44, %v1559_v44  ;;  %v711_v60 = vpack.c.bf16 %v680_v46, %v679_v39  ;;  %v363_v61 = vpop.f32.mrb[19].mxu0 }
 0x14e   :  { %v595_v63 = vmul.f32 0.7978846, %v563_v48  ;;  %v564_v62 = vadd.f32 %v532_v49, %v1542_v18  ;;  %v471_v1 = vmul.f32 %v1564_v50, %v1564_v50  ;;  %v1574_v2 = vadd.f32 %v1126_v54, %v1478_v32 }
 0x14f   :  { %1251 = vtanh.f32 %v597_v55  ;;  %v598_v3 = vmul.f32 0.7978846, %v566_v56  ;;  %v505_v53 = vmul.f32 %v473_v57, %v1559_v44  ;;  %1155 = vmatprep.mubr.bf16.mxu1 %v711_v60  ;;  %v682_v59 = vmul.f32 %v650_v8, %v1489_v58 }
 0x150   :  { %1253 = vtanh.f32 %v595_v63  ;;  %v596_v4 = vmul.f32 0.7978846, %v564_v62  ;;  %v503_v5 = vmul.f32 %v471_v1, %v1564_v50  ;;  %v474_v7 = vmul.f32 %v1574_v2, %v1574_v2 }
 0x151   :  { %v1581_v9 = vpop.eup %1243  ;;  %1255 = vtanh.f32 %v598_v3  ;;  %v537_v10 = vmul.f32 0.044715, %v505_v53  ;;  %v712_v11 = vpack.c.bf16 %v682_v59, %v681_v52  ;;  %v1584_v13 = vadd.f32 %v1478_v32, %v363_v61 }
 0x152   :  { %v1586_v14 = vpop.eup %1245  ;;  %1257 = vtanh.f32 %v596_v4  ;;  %v535_v15 = vmul.f32 0.044715, %v503_v5  ;;  %v506_v58 = vmul.f32 %v474_v7, %v1574_v2  ;;  %v1129_v8 = vpop.f32.mrb[20].mxu0  ;;  %v651_v16 = vadd.f32 1.0, %v1238_v34 }
 0x153   :  { %v1589_v19 = vpop.eup %1247  ;;  %v569_v20 = vadd.f32 %v537_v10, %v1559_v44  ;;  %1156 = vmatmul.mubr.bf16.vlgmr.msra.gmra.mrb[0].mxu1 %v712_v11  ;;  %v472_v22 = vmul.f32 %v1584_v13, %v1584_v13  ;;  %v1595_v23 = vadd.f32 %v1129_v8, %v1478_v32  ;;  %v376_v25 = vpop.f32.mrb[21].mxu0  ;;  %v652_v27 = vadd.f32 1.0, %v1242_v47 }
 0x154   :  { %v1597_v29 = vpop.eup %1249  ;;  %v567_v30 = vadd.f32 %v535_v15, %v1564_v50  ;;  %v538_v33 = vmul.f32 0.044715, %v506_v58  ;;  %v1601_v34 = vadd.f32 %v1478_v32, %v376_v25  ;;  %v683_v35 = vmul.f32 %v651_v16, %v1496_v17  ;;  %v1130_v37 = vpop.f32.mrb[22].mxu0 }
 0x155   :  { %v601_v38 = vmul.f32 0.7978846, %v569_v20  ;;  %v504_v39 = vmul.f32 %v472_v22, %v1584_v13  ;;  %v477_v42 = vmul.f32 %v1595_v23, %v1595_v23  ;;  %v684_v43 = vmul.f32 %v652_v27, %v1498_v21  ;;  %v379_v45 = vpop.f32.mrb[23].mxu0 }
 0x156   :  { %v599_v46 = vmul.f32 0.7978846, %v567_v30  ;;  %v570_v47 = vadd.f32 %v538_v33, %v1574_v2  ;;  %v475_v48 = vmul.f32 %v1601_v34, %v1601_v34  ;;  %v1612_v49 = vadd.f32 %v1130_v37, %v1478_v32 }
 0x157   :  { %1259 = vtanh.f32 %v601_v38  ;;  %v536_v17 = vmul.f32 0.044715, %v504_v39  ;;  %v509_v54 = vmul.f32 %v477_v42, %v1595_v23  ;;  %v713_v52 = vpack.c.bf16 %v684_v43, %v683_v35 }
 0x158   :  { %1261 = vtanh.f32 %v599_v46  ;;  %v602_v55 = vmul.f32 0.7978846, %v570_v47  ;;  %v507_v56 = vmul.f32 %v475_v48, %v1601_v34  ;;  %v478_v21 = vmul.f32 %v1612_v49, %v1612_v49 }
 0x159   :  { %v1618_v57 = vpop.eup %1251  ;;  %v568_v60 = vadd.f32 %v536_v17, %v1584_v13  ;;  %v541_v61 = vmul.f32 0.044715, %v509_v54  ;;  %1159 = vmatprep.mubr.bf16.mxu1 %v713_v52  ;;  %v653_v63 = vadd.f32 1.0, %v1550_v28  ;;  %v654_v62 = vadd.f32 1.0, %v1555_v40 }
 0x15a   :  { %v1623_v1 = vpop.eup %1253  ;;  %1263 = vtanh.f32 %v602_v55  ;;  %v539_v3 = vmul.f32 0.044715, %v507_v56  ;;  %v510_v53 = vmul.f32 %v478_v21, %v1612_v49  ;;  %v1627_v59 = vadd.f32 %v1478_v32, %v379_v45  ;;  %v1133_v4 = vpop.f32.mrb[24].mxu0 }
 0x15b   :  { %v1629_v5 = vpop.eup %1255  ;;  %v600_v7 = vmul.f32 0.7978846, %v568_v60  ;;  %v573_v10 = vadd.f32 %v541_v61, %v1595_v23  ;;  %v685_v11 = vmul.f32 %v653_v63, %v1503_v26  ;;  %v686_v28 = vmul.f32 %v654_v62, %v1506_v31  ;;  %v392_v40 = vpop.f32.mrb[25].mxu0 }
 0x15c   :  { %v1634_v15 = vpop.eup %1257  ;;  %v571_v58 = vadd.f32 %v539_v3, %v1601_v34  ;;  %v542_v8 = vmul.f32 0.044715, %v510_v53  ;;  %v476_v16 = vmul.f32 %v1627_v59, %v1627_v59  ;;  %v1640_v20 = vadd.f32 %v1133_v4, %v1478_v32  ;;  %v1134_v22 = vpop.f32.mrb[26].mxu0 }
 0x15d   :  { %1265 = vtanh.f32 %v600_v7  ;;  %v605_v25 = vmul.f32 0.7978846, %v573_v10  ;;  %v714_v27 = vpack.c.bf16 %v686_v28, %v685_v11  ;;  %v1643_v26 = vadd.f32 %v1478_v32, %v392_v40  ;;  %v395_v31 = vpop.f32.mrb[27].mxu0 }
 0x15e   :  { %v603_v30 = vmul.f32 0.7978846, %v571_v58  ;;  %v574_v33 = vadd.f32 %v542_v8, %v1612_v49  ;;  %v508_v35 = vmul.f32 %v476_v16, %v1627_v59  ;;  %v481_v37 = vmul.f32 %v1640_v20, %v1640_v20 }
 0x15f   :  { %1267 = vtanh.f32 %v605_v25  ;;  %1160 = vmatmul.mubr.bf16.gmra.mrb[4].mxu1 %v714_v27  ;;  %v479_v38 = vmul.f32 %v1643_v26, %v1643_v26  ;;  %v432_v39 = vmul.f32 0.5, %v1514_v41  ;;  %v655_v42 = vadd.f32 1.0, %v1586_v14 }
 0x160   :  { %1269 = vtanh.f32 %v603_v30  ;;  %v606_v43 = vmul.f32 0.7978846, %v574_v33  ;;  %v540_v45 = vmul.f32 0.044715, %v508_v35  ;;  %v513_v46 = vmul.f32 %v481_v37, %v1640_v20 }
 0x161   :  { %v1654_v47 = vpop.eup %1259  ;;  %v511_v48 = vmul.f32 %v479_v38, %v1643_v26  ;;  %v656_v17 = vadd.f32 1.0, %v1597_v29  ;;  %v687_v54 = vmul.f32 %v655_v42, %v1522_v51  ;;  %v1660_v52 = vadd.f32 %v1134_v22, %v1478_v32 }
 0x162   :  { %v1662_v55 = vpop.eup %1261  ;;  %1271 = vtanh.f32 %v606_v43  ;;  %v572_v41 = vadd.f32 %v540_v45, %v1627_v59  ;;  %v545_v14 = vmul.f32 0.044715, %v513_v46  ;;  %v433_v56 = vmul.f32 0.5, %v1501_v24  ;;  %v1137_v21 = vpop.f32.mrb[28].mxu0 }
 0x163   :  { %v543_v60 = vmul.f32 0.044715, %v511_v48  ;;  %v688_v61 = vmul.f32 %v656_v17, %v432_v39  ;;  %v482_v63 = vmul.f32 %v1660_v52, %v1660_v52  ;;  %v434_v29 = vmul.f32 0.5, %v1511_v36  ;;  %v408_v51 = vpop.f32.mrb[29].mxu0 }
 0x164   :  { %v1669_v62 = vpop.eup %1263  ;;  %v604_v3 = vmul.f32 0.7978846, %v572_v41  ;;  %v577_v53 = vadd.f32 %v545_v14, %v1640_v20  ;;  %v657_v4 = vadd.f32 1.0, %v1581_v9  ;;  %v658_v7 = vadd.f32 1.0, %v1589_v19  ;;  %v1138_v10 = vpop.f32.mrb[30].mxu0 }
 0x165   :  { %v575_v24 = vadd.f32 %v543_v60, %v1643_v26  ;;  %v715_v11 = vpack.c.bf16 %v688_v61, %v687_v54  ;;  %v514_v28 = vmul.f32 %v482_v63, %v1660_v52  ;;  %v1677_v40 = vadd.f32 %v1478_v32, %v395_v31  ;;  %v411_v36 = vpop.f32.mrb[31].mxu0 }
 0x166   :  { %1273 = vtanh.f32 %v604_v3  ;;  %v609_v58 = vmul.f32 0.7978846, %v577_v53  ;;  %v689_v8 = vmul.f32 %v657_v4, %v433_v56  ;;  %v690_v16 = vmul.f32 %v658_v7, %v434_v29 }
 0x167   :  { %v1266_v22 = vpop.eup %1265  ;;  %v607_v25 = vmul.f32 0.7978846, %v575_v24  ;;  %1163 = vmatprep.mubr.bf16.mxu1 %v715_v11  ;;  %v546_v9 = vmul.f32 0.044715, %v514_v28  ;;  %v480_v19 = vmul.f32 %v1677_v40, %v1677_v40  ;;  %v1682_v27 = vadd.f32 %v1137_v21, %v1478_v32 }
 0x168   :  { %1275 = vtanh.f32 %v609_v58  ;;  %v716_v30 = vpack.c.bf16 %v690_v16, %v689_v8  ;;  %v1685_v31 = vadd.f32 %v1478_v32, %v408_v51  ;;  %v435_v33 = vmul.f32 0.5, %v1530_v6 }
 0x169   :  { %v1688_v35 = vpop.eup %1267  ;;  %1277 = vtanh.f32 %v607_v25  ;;  %v578_v37 = vadd.f32 %v546_v9, %v1660_v52  ;;  %v512_v38 = vmul.f32 %v480_v19, %v1677_v40  ;;  %v485_v39 = vmul.f32 %v1682_v27, %v1682_v27 }
 0x16a   :  { %v1270_v42 = vpop.eup %1269  ;;  %1164 = vmatmul.mubr.bf16.gmra.mrb[8].mxu1 %v716_v30  ;;  %v483_v43 = vmul.f32 %v1685_v31, %v1685_v31  ;;  %v436_v45 = vmul.f32 0.5, %v1542_v18  ;;  %v659_v46 = vadd.f32 1.0, %v1623_v1  ;;  %v660_v6 = vadd.f32 1.0, %v1634_v15 }
 0x16b   :  { %v610_v48 = vmul.f32 0.7978846, %v578_v37  ;;  %v544_v17 = vmul.f32 0.044715, %v512_v38  ;;  %v517_v54 = vmul.f32 %v485_v39, %v1682_v27  ;;  %v1701_v41 = vadd.f32 %v1138_v10, %v1478_v32 }
 0x16c   :  { %v1272_v14 = vpop.eup %1271  ;;  %v515_v56 = vmul.f32 %v483_v43, %v1685_v31  ;;  %v691_v21 = vmul.f32 %v659_v46, %v435_v33  ;;  %v692_v60 = vmul.f32 %v660_v6, %v436_v45  ;;  %v437_v61 = vmul.f32 0.5, %v1527_v0 }
 0x16d   :  { %1279 = vtanh.f32 %v610_v48  ;;  %v576_v18 = vadd.f32 %v544_v17, %v1677_v40  ;;  %v549_v1 = vmul.f32 0.044715, %v517_v54  ;;  %v486_v15 = vmul.f32 %v1701_v41, %v1701_v41 }
 0x16e   :  { %v547_v63 = vmul.f32 0.044715, %v515_v56  ;;  %v717_v29 = vpack.c.bf16 %v692_v60, %v691_v21  ;;  %v438_v51 = vmul.f32 0.5, %v1536_v12  ;;  %v661_v3 = vadd.f32 1.0, %v1618_v57 }
 0x16f   :  { %v608_v53 = vmul.f32 0.7978846, %v576_v18  ;;  %v581_v4 = vadd.f32 %v549_v1, %v1682_v27  ;;  %v518_v7 = vmul.f32 %v486_v15, %v1701_v41  ;;  %v662_v0 = vadd.f32 1.0, %v1629_v5 }
 0x170   :  { %v1274_v10 = vpop.eup %1273  ;;  %v579_v24 = vadd.f32 %v547_v63, %v1685_v31  ;;  %1167 = vmatprep.mubr.bf16.mxu1 %v717_v29  ;;  %v693_v11 = vmul.f32 %v661_v3, %v437_v61  ;;  %v1715_v28 = vadd.f32 %v1478_v32, %v411_v36  ;;  %v439_v58 = vmul.f32 0.5, %v1564_v50 }
 0x171   :  { %1281 = vtanh.f32 %v608_v53  ;;  %v613_v12 = vmul.f32 0.7978846, %v581_v4  ;;  %v550_v57 = vmul.f32 0.044715, %v518_v7  ;;  %v694_v8 = vmul.f32 %v662_v0, %v438_v51 }
 0x172   :  { %v1276_v16 = vpop.eup %1275  ;;  %v611_v25 = vmul.f32 0.7978846, %v579_v24  ;;  %v484_v9 = vmul.f32 %v1715_v28, %v1715_v28  ;;  %v440_v5 = vmul.f32 0.5, %v1584_v13  ;;  %v663_v19 = vadd.f32 1.0, %v1662_v55 }
 0x173   :  { %v1278_v30 = vpop.eup %1277  ;;  %1283 = vtanh.f32 %v613_v12  ;;  %v582_v32 = vadd.f32 %v550_v57, %v1701_v41  ;;  %v718_v36 = vpack.c.bf16 %v694_v8, %v693_v11  ;;  %v664_v33 = vadd.f32 1.0, %v1266_v22 }
 0x174   :  { %1285 = vtanh.f32 %v611_v25  ;;  %v516_v50 = vmul.f32 %v484_v9, %v1715_v28  ;;  %v695_v37 = vmul.f32 %v663_v19, %v439_v58  ;;  %v441_v43 = vmul.f32 0.5, %v1559_v44 }
 0x175   :  { %v614_v38 = vmul.f32 0.7978846, %v582_v32  ;;  %1168 = vmatmul.mubr.bf16.gmra.mrb[12].mxu1 %v718_v36  ;;  %v696_v39 = vmul.f32 %v664_v33, %v440_v5  ;;  %v665_v45 = vadd.f32 1.0, %v1654_v47  ;;  %v442_v55 = vmul.f32 0.5, %v1574_v2 }
 0x176   :  { %v548_v13 = vmul.f32 0.044715, %v516_v50  ;;  %v666_v46 = vadd.f32 1.0, %v1669_v62  ;;  %v443_v6 = vmul.f32 0.5, %v1601_v34  ;;  %v444_v17 = vmul.f32 0.5, %v1627_v59 }
 0x177   :  { %v1280_v48 = vpop.eup %1279  ;;  %1287 = vtanh.f32 %v614_v38  ;;  %v719_v22 = vpack.c.bf16 %v696_v39, %v695_v37  ;;  %v667_v54 = vadd.f32 1.0, %v1270_v42  ;;  %v697_v21 = vmul.f32 %v665_v45, %v441_v43 }
 0x178   :  { %v580_v56 = vadd.f32 %v548_v13, %v1715_v28  ;;  %v698_v60 = vmul.f32 %v666_v46, %v442_v55  ;;  %v668_v44 = vadd.f32 1.0, %v1274_v10  ;;  %v445_v47 = vmul.f32 0.5, %v1595_v23 }
 0x179   :  { %1171 = vmatprep.mubr.bf16.mxu1 %v719_v22  ;;  %v446_v2 = vmul.f32 0.5, %v1612_v49  ;;  %v669_v62 = vadd.f32 1.0, %v1688_v35  ;;  %v670_v61 = vadd.f32 1.0, %v1272_v14  ;;  %v699_v1 = vmul.f32 %v667_v54, %v443_v6 }
 0x17a   :  { %v612_v34 = vmul.f32 0.7978846, %v580_v56  ;;  %v720_v18 = vpack.c.bf16 %v698_v60, %v697_v21  ;;  %v700_v15 = vmul.f32 %v668_v44, %v444_v17  ;;  %v447_v29 = vmul.f32 0.5, %v1643_v26 }
 0x17b   :  { %v1282_v63 = vpop.eup %1281  ;;  %v701_v59 = vmul.f32 %v669_v62, %v445_v47  ;;  %v702_v42 = vmul.f32 %v670_v61, %v446_v2  ;;  %v671_v51 = vadd.f32 1.0, %v1278_v30  ;;  %v448_v53 = vmul.f32 0.5, %v1677_v40 }
 0x17c   :  { %1289 = vtanh.f32 %v612_v34  ;;  %v721_v3 = vpack.c.bf16 %v700_v15, %v699_v1  ;;  %v672_v23 = vadd.f32 1.0, %v1282_v63  ;;  %v449_v35 = vmul.f32 0.5, %v1640_v20 }
 0x17d   :  { %v1284_v4 = vpop.eup %1283  ;;  %1172 = vmatmul.mubr.bf16.gmra.mrb[16].mxu1 %v720_v18  ;;  %v722_v49 = vpack.c.bf16 %v702_v42, %v701_v59  ;;  %v673_v14 = vadd.f32 1.0, %v1276_v16  ;;  %v703_v0 = vmul.f32 %v671_v51, %v447_v29  ;;  %v450_v24 = vmul.f32 0.5, %v1660_v52 }
 0x17e   :  { %v1286_v7 = vpop.eup %1285  ;;  %1175 = vmatprep.mubr.bf16.mxu1 %v721_v3  ;;  %v704_v10 = vmul.f32 %v672_v23, %v448_v53  ;;  %v674_v11 = vadd.f32 1.0, %v1280_v48  ;;  %v677_v57 = vadd.f32 1.0, %v1284_v4  ;;  %v453_v25 = vmul.f32 0.5, %v1682_v27  ;;  %v1745_v27 = vld [vmem:[%s1795_s4] ss:$0 sm:$0xff]  ;;  %s1390_s4 = smov [#allocation8]  }
 0x17f   :  { %v705_v58 = vmul.f32 %v673_v14, %v449_v35  ;;  %v454_v9 = vmul.f32 0.5, %v1701_v41  ;;  %v675_v19 = vadd.f32 1.0, %v1286_v7  ;;  %v451_v52 = vmul.f32 0.5, %v1685_v31  ;;  %s996_s6 = sshll.u32 %s1390_s4, 4  ;;  %s997_s6 = int_to_ptr.vmem [resolvable:$true] %s996_s6 }
 0x180   :  { %v723_v26 = vpack.c.bf16 %v704_v10, %v703_v0  ;;  %v706_v12 = vmul.f32 %v674_v11, %v450_v24  ;;  %v709_v20 = vmul.f32 %v677_v57, %v453_v25  ;;  %v452_v36 = vmul.f32 0.5, %v1715_v28  ;;  %s1357_s7 = scalar_lea.vmem %s997_s6, 4096  ;;  %p1362_p11 = scmp.lt.s32.totalorder %s997_s6, %s997_s6 }
 0x181   :  { %v1288_v8 = vpop.eup %1287  ;;  %v707_v50 = vmul.f32 %v675_v19, %v451_v52  ;;  %p1358_p10 = scmp.ne.s32.totalorder %s997_s6, %s1357_s7  ;;  %p1363_p12 = scmp.lt.s32.totalorder %s1357_s7, %s1357_s7 }
 0x182   :  { %v724_v40 = vpack.c.bf16 %v706_v12, %v705_v58  ;;  %v678_v5 = vadd.f32 1.0, %v1288_v8 }
 0x183   :  { %p1364_p13 = por %p1363_p12, %p1362_p11 }
 0x184   :  { %v710_v16 = vmul.f32 %v678_v5, %v454_v9 }
 0x185   :  { %1176 = vmatmul.mubr.bf16.gmra.mrb[20].mxu1 %v722_v49  ;;  %p1365_p0 = pnand %p1364_p13, %p1358_p10 }
 0x186   :  { %v1290_v30 = vpop.eup %1289  ;;  %1179 = vmatprep.mubr.bf16.mxu1 %v723_v26  ;;  %v726_v32 = vpack.c.bf16 %v710_v16, %v709_v20 }
 0x187   :  { %v676_v33 = vadd.f32 1.0, %v1290_v30 }
 0x189   :  { %v708_v37 = vmul.f32 %v676_v33, %v452_v36 }
 0x18b   :  { %v725_v38 = vpack.c.bf16 %v708_v37, %v707_v50 }
 0x18d   :  { %1180 = vmatmul.mubr.bf16.gmra.mrb[24].mxu1 %v724_v40 }
 0x18e   :  { %1183 = vmatprep.mubr.bf16.mxu1 %v725_v38 }
 0x195   :  { %1184 = vmatmul.mubr.bf16.gmra.mrb[28].mxu1 %v726_v32 }
 0x226   :  { %v1157_v41 = vpop.f32.mrb[0].mxu1 }
 0x227   :  { %v841_v39 = vadd.f32 %v1157_v41, %v1745_v27  ;;  %v832_v43 = vpop.f32.mrb[1].mxu1 }
 0x228   :  { %v833_v31 = vadd.f32 %v1745_v27, %v832_v43  ;;  %v1158_v45 = vpop.f32.mrb[2].mxu1 }
 0x229   :  { %961 = vst [vmem:[#allocation8 + $0x10] sm:$0xff] %v841_v39  ;;  %v844_v28 = vadd.f32 %v1158_v45, %v1745_v27  ;;  %v835_v13 = vpop.f32.mrb[3].mxu1 }
 0x22a   :  { %959 = vst [vmem:[#allocation8] sm:$0xff] %v833_v31  ;;  %v836_v55 = vadd.f32 %v1745_v27, %v835_v13 }
 0x22b   :  { %962 = vst [vmem:[#allocation8 + $0x18] sm:$0xff] %v844_v28 }
 0x22c   :  { %960 = vst [vmem:[#allocation8 + $0x8] sm:$0xff] %v836_v55 }
 0x232   :  { %v1161_v46 = vpop.f32.mrb[4].mxu1 }
 0x233   :  { %v857_v6 = vadd.f32 %v1161_v46, %v1745_v27  ;;  %v848_v48 = vpop.f32.mrb[5].mxu1 }
 0x234   :  { %v849_v22 = vadd.f32 %v1745_v27, %v848_v48  ;;  %v1162_v17 = vpop.f32.mrb[6].mxu1 }
 0x235   :  { %965 = vst [vmem:[#allocation8 + $0x30] sm:$0xff] %v857_v6  ;;  %v860_v54 = vadd.f32 %v1162_v17, %v1745_v27  ;;  %v851_v56 = vpop.f32.mrb[7].mxu1 }
 0x236   :  { %963 = vst [vmem:[#allocation8 + $0x20] sm:$0xff] %v849_v22  ;;  %v852_v21 = vadd.f32 %v1745_v27, %v851_v56 }
 0x237   :  { %966 = vst [vmem:[#allocation8 + $0x38] sm:$0xff] %v860_v54 }
 0x238   :  { %964 = vst [vmem:[#allocation8 + $0x28] sm:$0xff] %v852_v21 }
 0x23d   :  { %v1165_v60 = vpop.f32.mrb[8].mxu1 }
 0x23e   :  { %v873_v44 = vadd.f32 %v1165_v60, %v1745_v27  ;;  %v864_v47 = vpop.f32.mrb[9].mxu1 }
 0x23f   :  { %v865_v2 = vadd.f32 %v1745_v27, %v864_v47  ;;  %v1166_v62 = vpop.f32.mrb[10].mxu1 }
 0x240   :  { %969 = vst [vmem:[#allocation8 + $0x50] sm:$0xff] %v873_v44  ;;  %v876_v61 = vadd.f32 %v1166_v62, %v1745_v27  ;;  %v867_v34 = vpop.f32.mrb[11].mxu1 }
 0x241   :  { %967 = vst [vmem:[#allocation8 + $0x40] sm:$0xff] %v865_v2  ;;  %v868_v18 = vadd.f32 %v1745_v27, %v867_v34 }
 0x242   :  { %970 = vst [vmem:[#allocation8 + $0x58] sm:$0xff] %v876_v61 }
 0x243   :  { %968 = vst [vmem:[#allocation8 + $0x48] sm:$0xff] %v868_v18 }
 0x248   :  { %v1169_v1 = vpop.f32.mrb[12].mxu1 }
 0x249   :  { %v889_v15 = vadd.f32 %v1169_v1, %v1745_v27  ;;  %v880_v63 = vpop.f32.mrb[13].mxu1 }
 0x24a   :  { %v881_v59 = vadd.f32 %v1745_v27, %v880_v63  ;;  %v1170_v42 = vpop.f32.mrb[14].mxu1 }
 0x24b   :  { %973 = vst [vmem:[#allocation8 + $0x70] sm:$0xff] %v889_v15  ;;  %v892_v29 = vadd.f32 %v1170_v42, %v1745_v27  ;;  %v883_v51 = vpop.f32.mrb[15].mxu1 }
 0x24c   :  { %971 = vst [vmem:[#allocation8 + $0x60] sm:$0xff] %v881_v59  ;;  %v884_v3 = vadd.f32 %v1745_v27, %v883_v51 }
 0x24d   :  { %974 = vst [vmem:[#allocation8 + $0x78] sm:$0xff] %v892_v29 }
 0x24e   :  { %972 = vst [vmem:[#allocation8 + $0x68] sm:$0xff] %v884_v3 }
 0x250   :  { %v1173_v53 = vpop.f32.mrb[16].mxu1 }
 0x251   :  { %v905_v23 = vadd.f32 %v1173_v53, %v1745_v27  ;;  %v896_v4 = vpop.f32.mrb[17].mxu1 }
 0x252   :  { %v897_v49 = vadd.f32 %v1745_v27, %v896_v4  ;;  %v1174_v35 = vpop.f32.mrb[18].mxu1 }
 0x253   :  { %977 = vst [vmem:[#allocation8 + $0x90] sm:$0xff] %v905_v23  ;;  %v908_v14 = vadd.f32 %v1174_v35, %v1745_v27  ;;  %v899_v7 = vpop.f32.mrb[19].mxu1 }
 0x254   :  { %975 = vst [vmem:[#allocation8 + $0x80] sm:$0xff] %v897_v49  ;;  %v900_v0 = vadd.f32 %v1745_v27, %v899_v7 }
 0x255   :  { %978 = vst [vmem:[#allocation8 + $0x98] sm:$0xff] %v908_v14 }
 0x256   :  { %976 = vst [vmem:[#allocation8 + $0x88] sm:$0xff] %v900_v0 }
 0x258   :  { %v1177_v10 = vpop.f32.mrb[20].mxu1 }
 0x259   :  { %v921_v24 = vadd.f32 %v1177_v10, %v1745_v27  ;;  %v912_v11 = vpop.f32.mrb[21].mxu1 }
 0x25a   :  { %v913_v26 = vadd.f32 %v1745_v27, %v912_v11  ;;  %v1178_v58 = vpop.f32.mrb[22].mxu1 }
 0x25b   :  { %981 = vst [vmem:[#allocation8 + $0xb0] sm:$0xff] %v921_v24  ;;  %v924_v12 = vadd.f32 %v1178_v58, %v1745_v27  ;;  %v915_v57 = vpop.f32.mrb[23].mxu1 }
 0x25c   :  { %979 = vst [vmem:[#allocation8 + $0xa0] sm:$0xff] %v913_v26  ;;  %v916_v8 = vadd.f32 %v1745_v27, %v915_v57 }
 0x25d   :  { %982 = vst [vmem:[#allocation8 + $0xb8] sm:$0xff] %v924_v12 }
 0x25e   :  { %980 = vst [vmem:[#allocation8 + $0xa8] sm:$0xff] %v916_v8 }
 0x260   :  { %v1181_v40 = vpop.f32.mrb[24].mxu1 }
 0x261   :  { %v937_v25 = vadd.f32 %v1181_v40, %v1745_v27  ;;  %v928_v9 = vpop.f32.mrb[25].mxu1 }
 0x262   :  { %v929_v5 = vadd.f32 %v1745_v27, %v928_v9  ;;  %v1182_v20 = vpop.f32.mrb[26].mxu1 }
 0x263   :  { %985 = vst [vmem:[#allocation8 + $0xd0] sm:$0xff] %v937_v25  ;;  %v940_v16 = vadd.f32 %v1182_v20, %v1745_v27  ;;  %v931_v19 = vpop.f32.mrb[27].mxu1 }
 0x264   :  { %983 = vst [vmem:[#allocation8 + $0xc0] sm:$0xff] %v929_v5  ;;  %v932_v30 = vadd.f32 %v1745_v27, %v931_v19 }
 0x265   :  { %986 = vst [vmem:[#allocation8 + $0xd8] sm:$0xff] %v940_v16 }
 0x266   :  { %984 = vst [vmem:[#allocation8 + $0xc8] sm:$0xff] %v932_v30 }
 0x268   :  { %v1185_v32 = vpop.f32.mrb[28].mxu1 }
 0x269   :  { %v953_v52 = vadd.f32 %v1185_v32, %v1745_v27  ;;  %v944_v36 = vpop.f32.mrb[29].mxu1 }
 0x26a   :  { %v945_v33 = vadd.f32 %v1745_v27, %v944_v36  ;;  %v1186_v50 = vpop.f32.mrb[30].mxu1 }
 0x26b   :  { %989 = vst [vmem:[#allocation8 + $0xf0] sm:$0xff] %v953_v52  ;;  %v956_v37 = vadd.f32 %v1186_v50, %v1745_v27  ;;  %v947_v38 = vpop.f32.mrb[31].mxu1 }
 0x26c   :  { %987 = vst [vmem:[#allocation8 + $0xe0] sm:$0xff] %v945_v33  ;;  %v948_v41 = vadd.f32 %v1745_v27, %v947_v38 }
 0x26d   :  { %990 = vst [vmem:[#allocation8 + $0xf8] sm:$0xff] %v956_v37 }
 0x26e   :  { %988 = vst [vmem:[#allocation8 + $0xe8] sm:$0xff] %v948_v41 }
 0x26f   :  { %1368 = shalt.err (!%p1365_p0)
}
 0x270   :  { %s1369_s10 = scalar_lea.hbm %s1796_s5, 4096 }
 0x271   :  { %p1370_p1 = scmp.ne.s32.totalorder %s1796_s5, %s1369_s10  ;;  %p1373_p2 = scmp.lt.u32.totalorder %s1369_s10, %s1796_s5 }
 0x273   :  { %p1375_p3 = pnand %p1373_p2, %p1370_p1 }
 0x275   :  { %1378 = shalt.err (!%p1375_p3)
}
 0x276   :  { %s1391_s15 = smov 128   ;;  %s1392_s16 = smov 8  }
 0x277   :  { %1002 = dma.vmem_to_hbm [thread:$0]  %s997_s6, 4096, %s1796_s5, [#allocation4], %s1391_s15, %s1391_s15, %s1392_s16  }
 0x278   :  { %1383 = dma.done.wait [#allocation4], 4096  }
 0x279   :  { %1384 = vsyncadd [#allocation4], 4294963200 }
 0x27a   :  { %1006 = vsyncpa [#allocation3], 1 }
 0x27b   :  { %1007 = vsyncpa [#allocation6], 1 }
 0x27c   :  { %1008 = vsyncpa [#allocation4], 1 }

// kernel: tpu_custom_call.1
= control target key start
LH: loop header
LB: loop body
LE: loop exit
PB: predicated region body
PF: predicated region fallthrough
CT: control target
= control target key end

     0   :  { %10 = vsyncpa [#allocation3], 0  ;;  %s1791_s0 = inlined_call_operand.hbm [shape: bf16[256,128], index: 0, kind: input, shape index: {}]   ;;  %s1792_s1 = inlined_call_operand.hbm [shape: bf16[128,128], index: 1, kind: input, shape index: {}]   ;;  %s1793_s2 = inlined_call_operand.vmem [shape: f32[1,128], index: 2, kind: input, shape index: {}]   ;;  %s1794_s3 = inlined_call_operand.hbm [shape: bf16[128,128], index: 3, kind: input, shape index: {}]   ;;  %s1795_s4 = inlined_call_operand.vmem [shape: f32[1,128], index: 4, kind: input, shape index: {}]   ;;  %s1796_s5 = inlined_call_operand.hbm [shape: f32[256,128], index: 5, kind: output, shape index: {}]  }
   0x1   :  { %11 = vsyncpa [#allocation6], 0 }
   0x2   :  { %12 = vsyncpa [#allocation4], 0  ;;  %s1385_s18 = smov [#allocation5]   ;;  %s1386_s20 = smov [#allocation2]  }
   0x3   :  { %s30_s19 = sshll.u32 %s1385_s18, 4  ;;  %s18_s21 = sshll.u32 %s1386_s20, 4  ;;  %s31_s19 = int_to_ptr.vmem [resolvable:$true] %s30_s19  ;;  %s1423_s21 = int_to_ptr.vmem [resolvable:$true] %s18_s21 }
   0x4   :  { %s1291_s24 = scalar_lea.hbm %s1792_s1, 1024 }
   0x5   :  { %p1292_p0 = scmp.ne.s32.totalorder %s1792_s1, %s1291_s24  ;;  %p1295_p1 = scmp.lt.u32.totalorder %s1291_s24, %s1792_s1 }
   0x7   :  { %p1297_p2 = pnand %p1295_p1, %p1292_p0 }
   0x9   :  { %1300 = shalt.err (!%p1297_p2)
}
   0xa   :  { %s1301_s29 = scalar_lea.vmem %s31_s19, 1024  ;;  %p1306_p4 = scmp.lt.s32.totalorder %s31_s19, %s31_s19 }
   0xb   :  { %p1302_p3 = scmp.ne.s32.totalorder %s31_s19, %s1301_s29  ;;  %p1307_p5 = scmp.lt.s32.totalorder %s1301_s29, %s1301_s29 }
   0xd   :  { %p1308_p6 = por %p1307_p5, %p1306_p4 }
   0xf   :  { %p1309_p7 = pnand %p1308_p6, %p1302_p3 }
  0x11   :  { %1312 = shalt.err (!%p1309_p7)
}
  0x12   :  { %s1387_s30 = smov 64   ;;  %s1388_s6 = smov 4  }
  0x13   :  { %36 = dma.hbm_to_vmem [thread:$0]  %s1792_s1, 1024, %s31_s19, [#allocation6], %s1387_s30, %s1387_s30, %s1388_s6  }
  0x14   :  { %s1313_s11 = scalar_lea.hbm %s1791_s0, 2048 }
  0x15   :  { %p1314_p8 = scmp.ne.s32.totalorder %s1791_s0, %s1313_s11  ;;  %p1317_p9 = scmp.lt.u32.totalorder %s1313_s11, %s1791_s0 }
  0x17   :  { %p1319_p10 = pnand %p1317_p9, %p1314_p8 }
  0x19   :  { %1322 = shalt.err (!%p1319_p10)
}
  0x1a   :  { %s1323_s16 = scalar_lea.vmem %s1423_s21, 2048  ;;  %p1328_p12 = scmp.lt.s32.totalorder %s1423_s21, %s1423_s21 }
  0x1b   :  { %p1324_p11 = scmp.ne.s32.totalorder %s1423_s21, %s1323_s16  ;;  %p1329_p13 = scmp.lt.s32.totalorder %s1323_s16, %s1323_s16 }
  0x1d   :  { %p1330_p0 = por %p1329_p13, %p1328_p12 }
  0x1f   :  { %p1331_p1 = pnand %p1330_p0, %p1324_p11 }
  0x21   :  { %1334 = shalt.err (!%p1331_p1)
}
  0x22   :  { %24 = dma.hbm_to_vmem [thread:$0]  %s1791_s0, 2048, %s1423_s21, [#allocation3], %s1387_s30, %s1387_s30, %s1388_s6  }
  0x23   :  { %s1389_s18 = smov [#allocation7]   ;;  %s1335_s23 = scalar_lea.hbm %s1794_s3, 1024 }
  0x24   :  { %s44_s19 = sshll.u32 %s1389_s18, 4  ;;  %p1336_p2 = scmp.ne.s32.totalorder %s1794_s3, %s1335_s23  ;;  %s45_s19 = int_to_ptr.vmem [resolvable:$true] %s44_s19 }
  0x25   :  { %p1339_p3 = scmp.lt.u32.totalorder %s1335_s23, %s1794_s3 }
  0x27   :  { %p1341_p4 = pnand %p1339_p3, %p1336_p2 }
  0x29   :  { %1344 = shalt.err (!%p1341_p4)
}
  0x2a   :  { %s1345_s28 = scalar_lea.vmem %s45_s19, 1024  ;;  %p1350_p6 = scmp.lt.s32.totalorder %s45_s19, %s45_s19 }
  0x2b   :  { %p1346_p5 = scmp.ne.s32.totalorder %s45_s19, %s1345_s28  ;;  %p1351_p7 = scmp.lt.s32.totalorder %s1345_s28, %s1345_s28 }
  0x2d   :  { %p1352_p8 = por %p1351_p7, %p1350_p6 }
  0x2f   :  { %p1353_p9 = pnand %p1352_p8, %p1346_p5 }
  0x31   :  { %1356 = shalt.err (!%p1353_p9)
}
  0x32   :  { %50 = dma.hbm_to_vmem [thread:$0]  %s1794_s3, 1024, %s45_s19, [#allocation6], %s1387_s30, %s1387_s30, %s1388_s6  }
  0x33   :  { %1379 = dma.done.wait [#allocation3], 2048  }
  0x34   :  { %1380 = vsyncadd [#allocation3], 4294965248 }
  0x35   :  { %1381 = dma.done.wait [#allocation6], 2048  }
  0x36   :  { %1382 = vsyncadd [#allocation6], 4294965248  ;;  %v1195_v0 = vld [vmem:[#allocation5] sm:$0xff]   ;;  %v1196_v1 = vld [vmem:[#allocation5 + $0x8] sm:$0xff]  }
  0x37   :  { %1091 = vmatprep.subr.bf16.mxu0 %v1195_v0  ;;  %v1197_v2 = vld [vmem:[#allocation5 + $0x10] sm:$0xff]   ;;  %v1198_v3 = vld [vmem:[#allocation5 + $0x18] sm:$0xff]   ;;  %v1203_v4 = vld [vmem:[#allocation2] sm:$0xff]  }
  0x38   :  { %1092 = vmatpush3.bf16.msra.mxu0 %v1195_v0  ;;  %1107 = vmatprep.mubr.bf16.mxu0 %v1203_v4  ;;  %v1199_v5 = vld [vmem:[#allocation5 + $0x20] sm:$0xff]   ;;  %v1200_v6 = vld [vmem:[#allocation5 + $0x28] sm:$0xff]   ;;  %v1201_v7 = vld [vmem:[#allocation5 + $0x30] sm:$0xff]  }
  0x39   :  { %1093 = vmatprep.subr.bf16.mxu0 %v1196_v1  ;;  %v1202_v8 = vld [vmem:[#allocation5 + $0x38] sm:$0xff]   ;;  %v1204_v9 = vld [vmem:[#allocation2 + $0x8] sm:$0xff]   ;;  %v1205_v10 = vld [vmem:[#allocation2 + $0x10] sm:$0xff]  }
  0x3a   :  { %v1206_v11 = vld [vmem:[#allocation2 + $0x18] sm:$0xff]   ;;  %v1207_v12 = vld [vmem:[#allocation2 + $0x20] sm:$0xff]   ;;  %v1208_v13 = vld [vmem:[#allocation2 + $0x28] sm:$0xff]  }
  0x3b   :  { %v1209_v14 = vld [vmem:[#allocation2 + $0x30] sm:$0xff]   ;;  %v1210_v15 = vld [vmem:[#allocation2 + $0x38] sm:$0xff]   ;;  %v1211_v16 = vld [vmem:[#allocation2 + $0x40] sm:$0xff]  }
  0x3c   :  { %1094 = vmatpush3.bf16.msra.mxu0 %v1196_v1  ;;  %v1212_v17 = vld [vmem:[#allocation2 + $0x48] sm:$0xff]   ;;  %v1213_v18 = vld [vmem:[#allocation2 + $0x50] sm:$0xff]   ;;  %v1214_v19 = vld [vmem:[#allocation2 + $0x58] sm:$0xff]  }
  0x3d   :  { %1095 = vmatprep.subr.bf16.mxu0 %v1197_v2  ;;  %v1215_v20 = vld [vmem:[#allocation2 + $0x60] sm:$0xff]   ;;  %v1216_v21 = vld [vmem:[#allocation2 + $0x68] sm:$0xff]   ;;  %v1217_v22 = vld [vmem:[#allocation2 + $0x70] sm:$0xff]  }
  0x3e   :  { %v1218_v23 = vld [vmem:[#allocation2 + $0x78] sm:$0xff]   ;;  %v1219_v24 = vld [vmem:[#allocation7] sm:$0xff]   ;;  %v1220_v25 = vld [vmem:[#allocation7 + $0x8] sm:$0xff]  }
  0x3f   :  { %1139 = vmatprep.subr.bf16.mxu1 %v1219_v24  ;;  %v1221_v26 = vld [vmem:[#allocation7 + $0x10] sm:$0xff]   ;;  %v1222_v27 = vld [vmem:[#allocation7 + $0x18] sm:$0xff]   ;;  %v1223_v28 = vld [vmem:[#allocation7 + $0x20] sm:$0xff]  }
  0x40   :  { %1096 = vmatpush3.bf16.msra.mxu0 %v1197_v2  ;;  %1140 = vmatpush3.bf16.msra.mxu1 %v1219_v24  ;;  %v1224_v29 = vld [vmem:[#allocation7 + $0x28] sm:$0xff]   ;;  %v1225_v30 = vld [vmem:[#allocation7 + $0x30] sm:$0xff]   ;;  %v1226_v31 = vld [vmem:[#allocation7 + $0x38] sm:$0xff]  }
  0x41   :  { %1097 = vmatprep.subr.bf16.mxu0 %v1198_v3  ;;  %1141 = vmatprep.subr.bf16.mxu1 %v1220_v25  ;;  %v1478_v32 = vld [vmem:[%s1793_s2] ss:$0 sm:$0xff] }
  0x44   :  { %1098 = vmatpush3.bf16.msra.mxu0 %v1198_v3  ;;  %1142 = vmatpush3.bf16.msra.mxu1 %v1220_v25 }
  0x45   :  { %1099 = vmatprep.subr.bf16.mxu0 %v1199_v5  ;;  %1143 = vmatprep.subr.bf16.mxu1 %v1221_v26 }
  0x48   :  { %1100 = vmatpush3.bf16.msra.mxu0 %v1199_v5  ;;  %1144 = vmatpush3.bf16.msra.mxu1 %v1221_v26 }
  0x49   :  { %1101 = vmatprep.subr.bf16.mxu0 %v1200_v6  ;;  %1145 = vmatprep.subr.bf16.mxu1 %v1222_v27 }
  0x4c   :  { %1102 = vmatpush3.bf16.msra.mxu0 %v1200_v6  ;;  %1146 = vmatpush3.bf16.msra.mxu1 %v1222_v27 }
  0x4d   :  { %1103 = vmatprep.subr.bf16.mxu0 %v1201_v7  ;;  %1147 = vmatprep.subr.bf16.mxu1 %v1223_v28 }
  0x50   :  { %1104 = vmatpush3.bf16.msra.mxu0 %v1201_v7  ;;  %1148 = vmatpush3.bf16.msra.mxu1 %v1223_v28 }
  0x51   :  { %1105 = vmatprep.subr.bf16.mxu0 %v1202_v8  ;;  %1149 = vmatprep.subr.bf16.mxu1 %v1224_v29 }
  0x54   :  { %1106 = vmatpush3.bf16.msra.mxu0 %v1202_v8  ;;  %1150 = vmatpush3.bf16.msra.mxu1 %v1224_v29 }
  0x55   :  { %1151 = vmatprep.subr.bf16.mxu1 %v1225_v30 }
  0x57   :  { %1108 = vmatmul.mubr.bf16.vlgmr.msra.gmra.mrb[0].mxu0 %v1204_v9 }
  0x58   :  { %1111 = vmatprep.mubr.bf16.mxu0 %v1205_v10  ;;  %1152 = vmatpush3.bf16.msra.mxu1 %v1225_v30 }
  0x59   :  { %1153 = vmatprep.subr.bf16.mxu1 %v1226_v31 }
  0x5c   :  { %1154 = vmatpush3.bf16.msra.mxu1 %v1226_v31 }
  0x5f   :  { %1112 = vmatmul.mubr.bf16.gmra.mrb[4].mxu0 %v1206_v11 }
  0x60   :  { %1115 = vmatprep.mubr.bf16.mxu0 %v1207_v12 }
  0x67   :  { %1116 = vmatmul.mubr.bf16.gmra.mrb[8].mxu0 %v1208_v13 }
  0x68   :  { %1119 = vmatprep.mubr.bf16.mxu0 %v1209_v14 }
  0x6f   :  { %1120 = vmatmul.mubr.bf16.gmra.mrb[12].mxu0 %v1210_v15 }
  0x70   :  { %1123 = vmatprep.mubr.bf16.mxu0 %v1211_v16 }
  0x77   :  { %1124 = vmatmul.mubr.bf16.gmra.mrb[16].mxu0 %v1212_v17 }
  0x78   :  { %1127 = vmatprep.mubr.bf16.mxu0 %v1213_v18 }
  0x7f   :  { %1128 = vmatmul.mubr.bf16.gmra.mrb[20].mxu0 %v1214_v19 }
  0x80   :  { %1131 = vmatprep.mubr.bf16.mxu0 %v1215_v20 }
  0x87   :  { %1132 = vmatmul.mubr.bf16.gmra.mrb[24].mxu0 %v1216_v21 }
  0x88   :  { %1135 = vmatprep.mubr.bf16.mxu0 %v1217_v22 }
  0x8f   :  { %1136 = vmatmul.mubr.bf16.gmra.mrb[28].mxu0 %v1218_v23 }
 0x12a   :  { %v1109_v33 = vpop.f32.mrb[0].mxu0 }
 0x12b   :  { %v305_v34 = vadd.f32 %v1109_v33, %v1478_v32  ;;  %v296_v35 = vpop.f32.mrb[1].mxu0 }
 0x12c   :  { %v297_v36 = vadd.f32 %v1478_v32, %v296_v35  ;;  %v1110_v37 = vpop.f32.mrb[2].mxu0 }
 0x12d   :  { %v457_v38 = vmul.f32 %v305_v34, %v305_v34  ;;  %v308_v39 = vadd.f32 %v1110_v37, %v1478_v32  ;;  %v299_v40 = vpop.f32.mrb[3].mxu0  ;;  %v1486_v53 = vmul.f32 0.5, %v305_v34 }
 0x12e   :  { %v455_v41 = vmul.f32 %v297_v36, %v297_v36  ;;  %v300_v42 = vadd.f32 %v1478_v32, %v299_v40  ;;  %v1484_v52 = vmul.f32 0.5, %v297_v36 }
 0x12f   :  { %v489_v43 = vmul.f32 %v457_v38, %v305_v34  ;;  %v458_v44 = vmul.f32 %v308_v39, %v308_v39  ;;  %v1489_v58 = vmul.f32 0.5, %v308_v39 }
 0x130   :  { %v487_v45 = vmul.f32 %v455_v41, %v297_v36  ;;  %v456_v46 = vmul.f32 %v300_v42, %v300_v42  ;;  %v1492_v62 = vmul.f32 0.5, %v300_v42 }
 0x131   :  { %v521_v47 = vmul.f32 0.044715, %v489_v43  ;;  %v490_v48 = vmul.f32 %v458_v44, %v308_v39 }
 0x132   :  { %v519_v49 = vmul.f32 0.044715, %v487_v45  ;;  %v488_v50 = vmul.f32 %v456_v46, %v300_v42  ;;  %v1113_v51 = vpop.f32.mrb[4].mxu0 }
 0x133   :  { %v553_v54 = vadd.f32 %v521_v47, %v305_v34  ;;  %v522_v55 = vmul.f32 0.044715, %v490_v48  ;;  %v321_v56 = vadd.f32 %v1113_v51, %v1478_v32  ;;  %v312_v57 = vpop.f32.mrb[5].mxu0 }
 0x134   :  { %v520_v59 = vmul.f32 0.044715, %v488_v50  ;;  %v313_v60 = vadd.f32 %v1478_v32, %v312_v57  ;;  %v1114_v61 = vpop.f32.mrb[6].mxu0  ;;  %v551_v63 = vadd.f32 %v519_v49, %v297_v36 }
 0x135   :  { %v585_v0 = vmul.f32 0.7978846, %v553_v54  ;;  %v554_v1 = vadd.f32 %v522_v55, %v308_v39  ;;  %v461_v2 = vmul.f32 %v321_v56, %v321_v56  ;;  %v324_v3 = vadd.f32 %v1114_v61, %v1478_v32  ;;  %v315_v4 = vpop.f32.mrb[7].mxu0 }
 0x136   :  { %v459_v5 = vmul.f32 %v313_v60, %v313_v60  ;;  %v316_v6 = vadd.f32 %v1478_v32, %v315_v4  ;;  %v552_v7 = vadd.f32 %v520_v59, %v300_v42  ;;  %v583_v8 = vmul.f32 0.7978846, %v551_v63 }
 0x137   :  { %1227 = vtanh.f32 %v585_v0  ;;  %v586_v9 = vmul.f32 0.7978846, %v554_v1  ;;  %v493_v10 = vmul.f32 %v461_v2, %v321_v56  ;;  %v462_v11 = vmul.f32 %v324_v3, %v324_v3 }
 0x138   :  { %v491_v12 = vmul.f32 %v459_v5, %v313_v60  ;;  %v460_v13 = vmul.f32 %v316_v6, %v316_v6  ;;  %v584_v14 = vmul.f32 0.7978846, %v552_v7  ;;  %1229 = vtanh.f32 %v583_v8 }
 0x139   :  { %1231 = vtanh.f32 %v586_v9  ;;  %v525_v15 = vmul.f32 0.044715, %v493_v10  ;;  %v494_v16 = vmul.f32 %v462_v11, %v324_v3  ;;  %v1496_v17 = vmul.f32 0.5, %v313_v60 }
 0x13a   :  { %v523_v18 = vmul.f32 0.044715, %v491_v12  ;;  %v492_v19 = vmul.f32 %v460_v13, %v316_v6  ;;  %v1117_v20 = vpop.f32.mrb[8].mxu0  ;;  %1233 = vtanh.f32 %v584_v14  ;;  %v1498_v21 = vmul.f32 0.5, %v316_v6 }
 0x13b   :  { %v557_v22 = vadd.f32 %v525_v15, %v321_v56  ;;  %v526_v23 = vmul.f32 0.044715, %v494_v16  ;;  %v1501_v24 = vadd.f32 %v1117_v20, %v1478_v32  ;;  %v328_v25 = vpop.f32.mrb[9].mxu0  ;;  %v1503_v26 = vmul.f32 0.5, %v321_v56 }
 0x13c   :  { %v555_v27 = vadd.f32 %v523_v18, %v313_v60  ;;  %v524_v28 = vmul.f32 0.044715, %v492_v19  ;;  %v329_v29 = vadd.f32 %v1478_v32, %v328_v25  ;;  %v1118_v30 = vpop.f32.mrb[10].mxu0  ;;  %v1506_v31 = vmul.f32 0.5, %v324_v3 }
 0x13d   :  { %v589_v33 = vmul.f32 0.7978846, %v557_v22  ;;  %v558_v34 = vadd.f32 %v526_v23, %v324_v3  ;;  %v465_v35 = vmul.f32 %v1501_v24, %v1501_v24  ;;  %v1511_v36 = vadd.f32 %v1118_v30, %v1478_v32  ;;  %v331_v37 = vpop.f32.mrb[11].mxu0 }
 0x13e   :  { %v587_v38 = vmul.f32 0.7978846, %v555_v27  ;;  %v556_v39 = vadd.f32 %v524_v28, %v316_v6  ;;  %v463_v40 = vmul.f32 %v329_v29, %v329_v29  ;;  %v1514_v41 = vadd.f32 %v1478_v32, %v331_v37 }
 0x13f   :  { %1235 = vtanh.f32 %v589_v33  ;;  %v590_v42 = vmul.f32 0.7978846, %v558_v34  ;;  %v497_v43 = vmul.f32 %v465_v35, %v1501_v24  ;;  %v466_v44 = vmul.f32 %v1511_v36, %v1511_v36 }
 0x140   :  { %1237 = vtanh.f32 %v587_v38  ;;  %v588_v45 = vmul.f32 0.7978846, %v556_v39  ;;  %v495_v46 = vmul.f32 %v463_v40, %v329_v29  ;;  %v464_v47 = vmul.f32 %v1514_v41, %v1514_v41 }
 0x141   :  { %v1228_v48 = vpop.eup %1227  ;;  %1239 = vtanh.f32 %v590_v42  ;;  %v529_v49 = vmul.f32 0.044715, %v497_v43  ;;  %v498_v50 = vmul.f32 %v466_v44, %v1511_v36  ;;  %v1522_v51 = vmul.f32 0.5, %v329_v29 }
 0x142   :  { %v1230_v54 = vpop.eup %1229  ;;  %1241 = vtanh.f32 %v588_v45  ;;  %v527_v55 = vmul.f32 0.044715, %v495_v46  ;;  %v496_v56 = vmul.f32 %v464_v47, %v1514_v41  ;;  %v1121_v57 = vpop.f32.mrb[12].mxu0  ;;  %v649_v59 = vadd.f32 1.0, %v1228_v48 }
 0x143   :  { %v1232_v60 = vpop.eup %1231  ;;  %v561_v61 = vadd.f32 %v529_v49, %v1501_v24  ;;  %v530_v63 = vmul.f32 0.044715, %v498_v50  ;;  %v1527_v0 = vadd.f32 %v1121_v57, %v1478_v32  ;;  %v344_v1 = vpop.f32.mrb[13].mxu0  ;;  %v647_v2 = vadd.f32 1.0, %v1230_v54 }
 0x144   :  { %v1234_v3 = vpop.eup %1233  ;;  %v559_v4 = vadd.f32 %v527_v55, %v329_v29  ;;  %v528_v5 = vmul.f32 0.044715, %v496_v56  ;;  %v1530_v6 = vadd.f32 %v1478_v32, %v344_v1  ;;  %v1122_v7 = vpop.f32.mrb[14].mxu0  ;;  %v650_v8 = vadd.f32 1.0, %v1232_v60 }
 0x145   :  { %v593_v9 = vmul.f32 0.7978846, %v561_v61  ;;  %v562_v10 = vadd.f32 %v530_v63, %v1511_v36  ;;  %v469_v11 = vmul.f32 %v1527_v0, %v1527_v0  ;;  %v1536_v12 = vadd.f32 %v1122_v7, %v1478_v32  ;;  %v347_v13 = vpop.f32.mrb[15].mxu0 }
 0x146   :  { %v591_v14 = vmul.f32 0.7978846, %v559_v4  ;;  %v560_v15 = vadd.f32 %v528_v5, %v1514_v41  ;;  %v467_v16 = vmul.f32 %v1530_v6, %v1530_v6  ;;  %v1542_v18 = vadd.f32 %v1478_v32, %v347_v13 }
 0x147   :  { %1243 = vtanh.f32 %v593_v9  ;;  %v594_v19 = vmul.f32 0.7978846, %v562_v10  ;;  %v501_v20 = vmul.f32 %v469_v11, %v1527_v0  ;;  %v470_v22 = vmul.f32 %v1536_v12, %v1536_v12 }
 0x148   :  { %1245 = vtanh.f32 %v591_v14  ;;  %v592_v23 = vmul.f32 0.7978846, %v560_v15  ;;  %v499_v25 = vmul.f32 %v467_v16, %v1530_v6  ;;  %v468_v27 = vmul.f32 %v1542_v18, %v1542_v18 }
 0x149   :  { %v1550_v28 = vpop.eup %1235  ;;  %1247 = vtanh.f32 %v594_v19  ;;  %v533_v29 = vmul.f32 0.044715, %v501_v20  ;;  %v502_v30 = vmul.f32 %v470_v22, %v1536_v12  ;;  %v648_v33 = vadd.f32 1.0, %v1234_v3 }
 0x14a   :  { %v1238_v34 = vpop.eup %1237  ;;  %1249 = vtanh.f32 %v592_v23  ;;  %v531_v35 = vmul.f32 0.044715, %v499_v25  ;;  %v500_v37 = vmul.f32 %v468_v27, %v1542_v18  ;;  %v1125_v38 = vpop.f32.mrb[16].mxu0  ;;  %v679_v39 = vmul.f32 %v647_v2, %v1484_v52 }
 0x14b   :  { %v1555_v40 = vpop.eup %1239  ;;  %v565_v42 = vadd.f32 %v533_v29, %v1527_v0  ;;  %v534_v43 = vmul.f32 0.044715, %v502_v30  ;;  %v1559_v44 = vadd.f32 %v1125_v38, %v1478_v32  ;;  %v360_v45 = vpop.f32.mrb[17].mxu0  ;;  %v680_v46 = vmul.f32 %v648_v33, %v1492_v62 }
 0x14c   :  { %v1242_v47 = vpop.eup %1241  ;;  %v563_v48 = vadd.f32 %v531_v35, %v1530_v6  ;;  %v532_v49 = vmul.f32 0.044715, %v500_v37  ;;  %v1564_v50 = vadd.f32 %v1478_v32, %v360_v45  ;;  %v1126_v54 = vpop.f32.mrb[18].mxu0  ;;  %v681_v52 = vmul.f32 %v649_v59, %v1486_v53 }
 0x14d   :  { %v597_v55 = vmul.f32 0.7978846, %v565_v42  ;;  %v566_v56 = vadd.f32 %v534_v43, %v1536_v12  ;;  %v473_v57 = vmul.f32 %v1559_v44, %v1559_v44  ;;  %v711_v60 = vpack.c.bf16 %v680_v46, %v679_v39  ;;  %v363_v61 = vpop.f32.mrb[19].mxu0 }
 0x14e   :  { %v595_v63 = vmul.f32 0.7978846, %v563_v48  ;;  %v564_v62 = vadd.f32 %v532_v49, %v1542_v18  ;;  %v471_v1 = vmul.f32 %v1564_v50, %v1564_v50  ;;  %v1574_v2 = vadd.f32 %v1126_v54, %v1478_v32 }
 0x14f   :  { %1251 = vtanh.f32 %v597_v55  ;;  %v598_v3 = vmul.f32 0.7978846, %v566_v56  ;;  %v505_v53 = vmul.f32 %v473_v57, %v1559_v44  ;;  %1155 = vmatprep.mubr.bf16.mxu1 %v711_v60  ;;  %v682_v59 = vmul.f32 %v650_v8, %v1489_v58 }
 0x150   :  { %1253 = vtanh.f32 %v595_v63  ;;  %v596_v4 = vmul.f32 0.7978846, %v564_v62  ;;  %v503_v5 = vmul.f32 %v471_v1, %v1564_v50  ;;  %v474_v7 = vmul.f32 %v1574_v2, %v1574_v2 }
 0x151   :  { %v1581_v9 = vpop.eup %1243  ;;  %1255 = vtanh.f32 %v598_v3  ;;  %v537_v10 = vmul.f32 0.044715, %v505_v53  ;;  %v712_v11 = vpack.c.bf16 %v682_v59, %v681_v52  ;;  %v1584_v13 = vadd.f32 %v1478_v32, %v363_v61 }
 0x152   :  { %v1586_v14 = vpop.eup %1245  ;;  %1257 = vtanh.f32 %v596_v4  ;;  %v535_v15 = vmul.f32 0.044715, %v503_v5  ;;  %v506_v58 = vmul.f32 %v474_v7, %v1574_v2  ;;  %v1129_v8 = vpop.f32.mrb[20].mxu0  ;;  %v651_v16 = vadd.f32 1.0, %v1238_v34 }
 0x153   :  { %v1589_v19 = vpop.eup %1247  ;;  %v569_v20 = vadd.f32 %v537_v10, %v1559_v44  ;;  %1156 = vmatmul.mubr.bf16.vlgmr.msra.gmra.mrb[0].mxu1 %v712_v11  ;;  %v472_v22 = vmul.f32 %v1584_v13, %v1584_v13  ;;  %v1595_v23 = vadd.f32 %v1129_v8, %v1478_v32  ;;  %v376_v25 = vpop.f32.mrb[21].mxu0  ;;  %v652_v27 = vadd.f32 1.0, %v1242_v47 }
 0x154   :  { %v1597_v29 = vpop.eup %1249  ;;  %v567_v30 = vadd.f32 %v535_v15, %v1564_v50  ;;  %v538_v33 = vmul.f32 0.044715, %v506_v58  ;;  %v1601_v34 = vadd.f32 %v1478_v32, %v376_v25  ;;  %v683_v35 = vmul.f32 %v651_v16, %v1496_v17  ;;  %v1130_v37 = vpop.f32.mrb[22].mxu0 }
 0x155   :  { %v601_v38 = vmul.f32 0.7978846, %v569_v20  ;;  %v504_v39 = vmul.f32 %v472_v22, %v1584_v13  ;;  %v477_v42 = vmul.f32 %v1595_v23, %v1595_v23  ;;  %v684_v43 = vmul.f32 %v652_v27, %v1498_v21  ;;  %v379_v45 = vpop.f32.mrb[23].mxu0 }
 0x156   :  { %v599_v46 = vmul.f32 0.7978846, %v567_v30  ;;  %v570_v47 = vadd.f32 %v538_v33, %v1574_v2  ;;  %v475_v48 = vmul.f32 %v1601_v34, %v1601_v34  ;;  %v1612_v49 = vadd.f32 %v1130_v37, %v1478_v32 }
 0x157   :  { %1259 = vtanh.f32 %v601_v38  ;;  %v536_v17 = vmul.f32 0.044715, %v504_v39  ;;  %v509_v54 = vmul.f32 %v477_v42, %v1595_v23  ;;  %v713_v52 = vpack.c.bf16 %v684_v43, %v683_v35 }
 0x158   :  { %1261 = vtanh.f32 %v599_v46  ;;  %v602_v55 = vmul.f32 0.7978846, %v570_v47  ;;  %v507_v56 = vmul.f32 %v475_v48, %v1601_v34  ;;  %v478_v21 = vmul.f32 %v1612_v49, %v1612_v49 }
 0x159   :  { %v1618_v57 = vpop.eup %1251  ;;  %v568_v60 = vadd.f32 %v536_v17, %v1584_v13  ;;  %v541_v61 = vmul.f32 0.044715, %v509_v54  ;;  %1159 = vmatprep.mubr.bf16.mxu1 %v713_v52  ;;  %v653_v63 = vadd.f32 1.0, %v1550_v28  ;;  %v654_v62 = vadd.f32 1.0, %v1555_v40 }
 0x15a   :  { %v1623_v1 = vpop.eup %1253  ;;  %1263 = vtanh.f32 %v602_v55  ;;  %v539_v3 = vmul.f32 0.044715, %v507_v56  ;;  %v510_v53 = vmul.f32 %v478_v21, %v1612_v49  ;;  %v1627_v59 = vadd.f32 %v1478_v32, %v379_v45  ;;  %v1133_v4 = vpop.f32.mrb[24].mxu0 }
 0x15b   :  { %v1629_v5 = vpop.eup %1255  ;;  %v600_v7 = vmul.f32 0.7978846, %v568_v60  ;;  %v573_v10 = vadd.f32 %v541_v61, %v1595_v23  ;;  %v685_v11 = vmul.f32 %v653_v63, %v1503_v26  ;;  %v686_v28 = vmul.f32 %v654_v62, %v1506_v31  ;;  %v392_v40 = vpop.f32.mrb[25].mxu0 }
 0x15c   :  { %v1634_v15 = vpop.eup %1257  ;;  %v571_v58 = vadd.f32 %v539_v3, %v1601_v34  ;;  %v542_v8 = vmul.f32 0.044715, %v510_v53  ;;  %v476_v16 = vmul.f32 %v1627_v59, %v1627_v59  ;;  %v1640_v20 = vadd.f32 %v1133_v4, %v1478_v32  ;;  %v1134_v22 = vpop.f32.mrb[26].mxu0 }
 0x15d   :  { %1265 = vtanh.f32 %v600_v7  ;;  %v605_v25 = vmul.f32 0.7978846, %v573_v10  ;;  %v714_v27 = vpack.c.bf16 %v686_v28, %v685_v11  ;;  %v1643_v26 = vadd.f32 %v1478_v32, %v392_v40  ;;  %v395_v31 = vpop.f32.mrb[27].mxu0 }
 0x15e   :  { %v603_v30 = vmul.f32 0.7978846, %v571_v58  ;;  %v574_v33 = vadd.f32 %v542_v8, %v1612_v49  ;;  %v508_v35 = vmul.f32 %v476_v16, %v1627_v59  ;;  %v481_v37 = vmul.f32 %v1640_v20, %v1640_v20 }
 0x15f   :  { %1267 = vtanh.f32 %v605_v25  ;;  %1160 = vmatmul.mubr.bf16.gmra.mrb[4].mxu1 %v714_v27  ;;  %v479_v38 = vmul.f32 %v1643_v26, %v1643_v26  ;;  %v432_v39 = vmul.f32 0.5, %v1514_v41  ;;  %v655_v42 = vadd.f32 1.0, %v1586_v14 }
 0x160   :  { %1269 = vtanh.f32 %v603_v30  ;;  %v606_v43 = vmul.f32 0.7978846, %v574_v33  ;;  %v540_v45 = vmul.f32 0.044715, %v508_v35  ;;  %v513_v46 = vmul.f32 %v481_v37, %v1640_v20 }
 0x161   :  { %v1654_v47 = vpop.eup %1259  ;;  %v511_v48 = vmul.f32 %v479_v38, %v1643_v26  ;;  %v656_v17 = vadd.f32 1.0, %v1597_v29  ;;  %v687_v54 = vmul.f32 %v655_v42, %v1522_v51  ;;  %v1660_v52 = vadd.f32 %v1134_v22, %v1478_v32 }
 0x162   :  { %v1662_v55 = vpop.eup %1261  ;;  %1271 = vtanh.f32 %v606_v43  ;;  %v572_v41 = vadd.f32 %v540_v45, %v1627_v59  ;;  %v545_v14 = vmul.f32 0.044715, %v513_v46  ;;  %v433_v56 = vmul.f32 0.5, %v1501_v24  ;;  %v1137_v21 = vpop.f32.mrb[28].mxu0 }
 0x163   :  { %v543_v60 = vmul.f32 0.044715, %v511_v48  ;;  %v688_v61 = vmul.f32 %v656_v17, %v432_v39  ;;  %v482_v63 = vmul.f32 %v1660_v52, %v1660_v52  ;;  %v434_v29 = vmul.f32 0.5, %v1511_v36  ;;  %v408_v51 = vpop.f32.mrb[29].mxu0 }
 0x164   :  { %v1669_v62 = vpop.eup %1263  ;;  %v604_v3 = vmul.f32 0.7978846, %v572_v41  ;;  %v577_v53 = vadd.f32 %v545_v14, %v1640_v20  ;;  %v657_v4 = vadd.f32 1.0, %v1581_v9  ;;  %v658_v7 = vadd.f32 1.0, %v1589_v19  ;;  %v1138_v10 = vpop.f32.mrb[30].mxu0 }
 0x165   :  { %v575_v24 = vadd.f32 %v543_v60, %v1643_v26  ;;  %v715_v11 = vpack.c.bf16 %v688_v61, %v687_v54  ;;  %v514_v28 = vmul.f32 %v482_v63, %v1660_v52  ;;  %v1677_v40 = vadd.f32 %v1478_v32, %v395_v31  ;;  %v411_v36 = vpop.f32.mrb[31].mxu0 }
 0x166   :  { %1273 = vtanh.f32 %v604_v3  ;;  %v609_v58 = vmul.f32 0.7978846, %v577_v53  ;;  %v689_v8 = vmul.f32 %v657_v4, %v433_v56  ;;  %v690_v16 = vmul.f32 %v658_v7, %v434_v29 }
 0x167   :  { %v1266_v22 = vpop.eup %1265  ;;  %v607_v25 = vmul.f32 0.7978846, %v575_v24  ;;  %1163 = vmatprep.mubr.bf16.mxu1 %v715_v11  ;;  %v546_v9 = vmul.f32 0.044715, %v514_v28  ;;  %v480_v19 = vmul.f32 %v1677_v40, %v1677_v40  ;;  %v1682_v27 = vadd.f32 %v1137_v21, %v1478_v32 }
 0x168   :  { %1275 = vtanh.f32 %v609_v58  ;;  %v716_v30 = vpack.c.bf16 %v690_v16, %v689_v8  ;;  %v1685_v31 = vadd.f32 %v1478_v32, %v408_v51  ;;  %v435_v33 = vmul.f32 0.5, %v1530_v6 }
 0x169   :  { %v1688_v35 = vpop.eup %1267  ;;  %1277 = vtanh.f32 %v607_v25  ;;  %v578_v37 = vadd.f32 %v546_v9, %v1660_v52  ;;  %v512_v38 = vmul.f32 %v480_v19, %v1677_v40  ;;  %v485_v39 = vmul.f32 %v1682_v27, %v1682_v27 }
 0x16a   :  { %v1270_v42 = vpop.eup %1269  ;;  %1164 = vmatmul.mubr.bf16.gmra.mrb[8].mxu1 %v716_v30  ;;  %v483_v43 = vmul.f32 %v1685_v31, %v1685_v31  ;;  %v436_v45 = vmul.f32 0.5, %v1542_v18  ;;  %v659_v46 = vadd.f32 1.0, %v1623_v1  ;;  %v660_v6 = vadd.f32 1.0, %v1634_v15 }
 0x16b   :  { %v610_v48 = vmul.f32 0.7978846, %v578_v37  ;;  %v544_v17 = vmul.f32 0.044715, %v512_v38  ;;  %v517_v54 = vmul.f32 %v485_v39, %v1682_v27  ;;  %v1701_v41 = vadd.f32 %v1138_v10, %v1478_v32 }
 0x16c   :  { %v1272_v14 = vpop.eup %1271  ;;  %v515_v56 = vmul.f32 %v483_v43, %v1685_v31  ;;  %v691_v21 = vmul.f32 %v659_v46, %v435_v33  ;;  %v692_v60 = vmul.f32 %v660_v6, %v436_v45  ;;  %v437_v61 = vmul.f32 0.5, %v1527_v0 }
 0x16d   :  { %1279 = vtanh.f32 %v610_v48  ;;  %v576_v18 = vadd.f32 %v544_v17, %v1677_v40  ;;  %v549_v1 = vmul.f32 0.044715, %v517_v54  ;;  %v486_v15 = vmul.f32 %v1701_v41, %v1701_v41 }
 0x16e   :  { %v547_v63 = vmul.f32 0.044715, %v515_v56  ;;  %v717_v29 = vpack.c.bf16 %v692_v60, %v691_v21  ;;  %v438_v51 = vmul.f32 0.5, %v1536_v12  ;;  %v661_v3 = vadd.f32 1.0, %v1618_v57 }
 0x16f   :  { %v608_v53 = vmul.f32 0.7978846, %v576_v18  ;;  %v581_v4 = vadd.f32 %v549_v1, %v1682_v27  ;;  %v518_v7 = vmul.f32 %v486_v15, %v1701_v41  ;;  %v662_v0 = vadd.f32 1.0, %v1629_v5 }
 0x170   :  { %v1274_v10 = vpop.eup %1273  ;;  %v579_v24 = vadd.f32 %v547_v63, %v1685_v31  ;;  %1167 = vmatprep.mubr.bf16.mxu1 %v717_v29  ;;  %v693_v11 = vmul.f32 %v661_v3, %v437_v61  ;;  %v1715_v28 = vadd.f32 %v1478_v32, %v411_v36  ;;  %v439_v58 = vmul.f32 0.5, %v1564_v50 }
 0x171   :  { %1281 = vtanh.f32 %v608_v53  ;;  %v613_v12 = vmul.f32 0.7978846, %v581_v4  ;;  %v550_v57 = vmul.f32 0.044715, %v518_v7  ;;  %v694_v8 = vmul.f32 %v662_v0, %v438_v51 }
 0x172   :  { %v1276_v16 = vpop.eup %1275  ;;  %v611_v25 = vmul.f32 0.7978846, %v579_v24  ;;  %v484_v9 = vmul.f32 %v1715_v28, %v1715_v28  ;;  %v440_v5 = vmul.f32 0.5, %v1584_v13  ;;  %v663_v19 = vadd.f32 1.0, %v1662_v55 }
 0x173   :  { %v1278_v30 = vpop.eup %1277  ;;  %1283 = vtanh.f32 %v613_v12  ;;  %v582_v32 = vadd.f32 %v550_v57, %v1701_v41  ;;  %v718_v36 = vpack.c.bf16 %v694_v8, %v693_v11  ;;  %v664_v33 = vadd.f32 1.0, %v1266_v22 }
 0x174   :  { %1285 = vtanh.f32 %v611_v25  ;;  %v516_v50 = vmul.f32 %v484_v9, %v1715_v28  ;;  %v695_v37 = vmul.f32 %v663_v19, %v439_v58  ;;  %v441_v43 = vmul.f32 0.5, %v1559_v44 }
 0x175   :  { %v614_v38 = vmul.f32 0.7978846, %v582_v32  ;;  %1168 = vmatmul.mubr.bf16.gmra.mrb[12].mxu1 %v718_v36  ;;  %v696_v39 = vmul.f32 %v664_v33, %v440_v5  ;;  %v665_v45 = vadd.f32 1.0, %v1654_v47  ;;  %v442_v55 = vmul.f32 0.5, %v1574_v2 }
 0x176   :  { %v548_v13 = vmul.f32 0.044715, %v516_v50  ;;  %v666_v46 = vadd.f32 1.0, %v1669_v62  ;;  %v443_v6 = vmul.f32 0.5, %v1601_v34  ;;  %v444_v17 = vmul.f32 0.5, %v1627_v59 }
 0x177   :  { %v1280_v48 = vpop.eup %1279  ;;  %1287 = vtanh.f32 %v614_v38  ;;  %v719_v22 = vpack.c.bf16 %v696_v39, %v695_v37  ;;  %v667_v54 = vadd.f32 1.0, %v1270_v42  ;;  %v697_v21 = vmul.f32 %v665_v45, %v441_v43 }
 0x178   :  { %v580_v56 = vadd.f32 %v548_v13, %v1715_v28  ;;  %v698_v60 = vmul.f32 %v666_v46, %v442_v55  ;;  %v668_v44 = vadd.f32 1.0, %v1274_v10  ;;  %v445_v47 = vmul.f32 0.5, %v1595_v23 }
 0x179   :  { %1171 = vmatprep.mubr.bf16.mxu1 %v719_v22  ;;  %v446_v2 = vmul.f32 0.5, %v1612_v49  ;;  %v669_v62 = vadd.f32 1.0, %v1688_v35  ;;  %v670_v61 = vadd.f32 1.0, %v1272_v14  ;;  %v699_v1 = vmul.f32 %v667_v54, %v443_v6 }
 0x17a   :  { %v612_v34 = vmul.f32 0.7978846, %v580_v56  ;;  %v720_v18 = vpack.c.bf16 %v698_v60, %v697_v21  ;;  %v700_v15 = vmul.f32 %v668_v44, %v444_v17  ;;  %v447_v29 = vmul.f32 0.5, %v1643_v26 }
 0x17b   :  { %v1282_v63 = vpop.eup %1281  ;;  %v701_v59 = vmul.f32 %v669_v62, %v445_v47  ;;  %v702_v42 = vmul.f32 %v670_v61, %v446_v2  ;;  %v671_v51 = vadd.f32 1.0, %v1278_v30  ;;  %v448_v53 = vmul.f32 0.5, %v1677_v40 }
 0x17c   :  { %1289 = vtanh.f32 %v612_v34  ;;  %v721_v3 = vpack.c.bf16 %v700_v15, %v699_v1  ;;  %v672_v23 = vadd.f32 1.0, %v1282_v63  ;;  %v449_v35 = vmul.f32 0.5, %v1640_v20 }
 0x17d   :  { %v1284_v4 = vpop.eup %1283  ;;  %1172 = vmatmul.mubr.bf16.gmra.mrb[16].mxu1 %v720_v18  ;;  %v722_v49 = vpack.c.bf16 %v702_v42, %v701_v59  ;;  %v673_v14 = vadd.f32 1.0, %v1276_v16  ;;  %v703_v0 = vmul.f32 %v671_v51, %v447_v29  ;;  %v450_v24 = vmul.f32 0.5, %v1660_v52 }
 0x17e   :  { %v1286_v7 = vpop.eup %1285  ;;  %1175 = vmatprep.mubr.bf16.mxu1 %v721_v3  ;;  %v704_v10 = vmul.f32 %v672_v23, %v448_v53  ;;  %v674_v11 = vadd.f32 1.0, %v1280_v48  ;;  %v677_v57 = vadd.f32 1.0, %v1284_v4  ;;  %v453_v25 = vmul.f32 0.5, %v1682_v27  ;;  %v1745_v27 = vld [vmem:[%s1795_s4] ss:$0 sm:$0xff]  ;;  %s1390_s4 = smov [#allocation8]  }
 0x17f   :  { %v705_v58 = vmul.f32 %v673_v14, %v449_v35  ;;  %v454_v9 = vmul.f32 0.5, %v1701_v41  ;;  %v675_v19 = vadd.f32 1.0, %v1286_v7  ;;  %v451_v52 = vmul.f32 0.5, %v1685_v31  ;;  %s996_s6 = sshll.u32 %s1390_s4, 4  ;;  %s997_s6 = int_to_ptr.vmem [resolvable:$true] %s996_s6 }
 0x180   :  { %v723_v26 = vpack.c.bf16 %v704_v10, %v703_v0  ;;  %v706_v12 = vmul.f32 %v674_v11, %v450_v24  ;;  %v709_v20 = vmul.f32 %v677_v57, %v453_v25  ;;  %v452_v36 = vmul.f32 0.5, %v1715_v28  ;;  %s1357_s7 = scalar_lea.vmem %s997_s6, 4096  ;;  %p1362_p11 = scmp.lt.s32.totalorder %s997_s6, %s997_s6 }
 0x181   :  { %v1288_v8 = vpop.eup %1287  ;;  %v707_v50 = vmul.f32 %v675_v19, %v451_v52  ;;  %p1358_p10 = scmp.ne.s32.totalorder %s997_s6, %s1357_s7  ;;  %p1363_p12 = scmp.lt.s32.totalorder %s1357_s7, %s1357_s7 }
 0x182   :  { %v724_v40 = vpack.c.bf16 %v706_v12, %v705_v58  ;;  %v678_v5 = vadd.f32 1.0, %v1288_v8 }
 0x183   :  { %p1364_p13 = por %p1363_p12, %p1362_p11 }
 0x184   :  { %v710_v16 = vmul.f32 %v678_v5, %v454_v9 }
 0x185   :  { %1176 = vmatmul.mubr.bf16.gmra.mrb[20].mxu1 %v722_v49  ;;  %p1365_p0 = pnand %p1364_p13, %p1358_p10 }
 0x186   :  { %v1290_v30 = vpop.eup %1289  ;;  %1179 = vmatprep.mubr.bf16.mxu1 %v723_v26  ;;  %v726_v32 = vpack.c.bf16 %v710_v16, %v709_v20 }
 0x187   :  { %v676_v33 = vadd.f32 1.0, %v1290_v30 }
 0x189   :  { %v708_v37 = vmul.f32 %v676_v33, %v452_v36 }
 0x18b   :  { %v725_v38 = vpack.c.bf16 %v708_v37, %v707_v50 }
 0x18d   :  { %1180 = vmatmul.mubr.bf16.gmra.mrb[24].mxu1 %v724_v40 }
 0x18e   :  { %1183 = vmatprep.mubr.bf16.mxu1 %v725_v38 }
 0x195   :  { %1184 = vmatmul.mubr.bf16.gmra.mrb[28].mxu1 %v726_v32 }
 0x226   :  { %v1157_v41 = vpop.f32.mrb[0].mxu1 }
 0x227   :  { %v841_v39 = vadd.f32 %v1157_v41, %v1745_v27  ;;  %v832_v43 = vpop.f32.mrb[1].mxu1 }
 0x228   :  { %v833_v31 = vadd.f32 %v1745_v27, %v832_v43  ;;  %v1158_v45 = vpop.f32.mrb[2].mxu1 }
 0x229   :  { %961 = vst [vmem:[#allocation8 + $0x10] sm:$0xff] %v841_v39  ;;  %v844_v28 = vadd.f32 %v1158_v45, %v1745_v27  ;;  %v835_v13 = vpop.f32.mrb[3].mxu1 }
 0x22a   :  { %959 = vst [vmem:[#allocation8] sm:$0xff] %v833_v31  ;;  %v836_v55 = vadd.f32 %v1745_v27, %v835_v13 }
 0x22b   :  { %962 = vst [vmem:[#allocation8 + $0x18] sm:$0xff] %v844_v28 }
 0x22c   :  { %960 = vst [vmem:[#allocation8 + $0x8] sm:$0xff] %v836_v55 }
 0x232   :  { %v1161_v46 = vpop.f32.mrb[4].mxu1 }
 0x233   :  { %v857_v6 = vadd.f32 %v1161_v46, %v1745_v27  ;;  %v848_v48 = vpop.f32.mrb[5].mxu1 }
 0x234   :  { %v849_v22 = vadd.f32 %v1745_v27, %v848_v48  ;;  %v1162_v17 = vpop.f32.mrb[6].mxu1 }
 0x235   :  { %965 = vst [vmem:[#allocation8 + $0x30] sm:$0xff] %v857_v6  ;;  %v860_v54 = vadd.f32 %v1162_v17, %v1745_v27  ;;  %v851_v56 = vpop.f32.mrb[7].mxu1 }
 0x236   :  { %963 = vst [vmem:[#allocation8 + $0x20] sm:$0xff] %v849_v22  ;;  %v852_v21 = vadd.f32 %v1745_v27, %v851_v56 }
 0x237   :  { %966 = vst [vmem:[#allocation8 + $0x38] sm:$0xff] %v860_v54 }
 0x238   :  { %964 = vst [vmem:[#allocation8 + $0x28] sm:$0xff] %v852_v21 }
 0x23d   :  { %v1165_v60 = vpop.f32.mrb[8].mxu1 }
 0x23e   :  { %v873_v44 = vadd.f32 %v1165_v60, %v1745_v27  ;;  %v864_v47 = vpop.f32.mrb[9].mxu1 }
 0x23f   :  { %v865_v2 = vadd.f32 %v1745_v27, %v864_v47  ;;  %v1166_v62 = vpop.f32.mrb[10].mxu1 }
 0x240   :  { %969 = vst [vmem:[#allocation8 + $0x50] sm:$0xff] %v873_v44  ;;  %v876_v61 = vadd.f32 %v1166_v62, %v1745_v27  ;;  %v867_v34 = vpop.f32.mrb[11].mxu1 }
 0x241   :  { %967 = vst [vmem:[#allocation8 + $0x40] sm:$0xff] %v865_v2  ;;  %v868_v18 = vadd.f32 %v1745_v27, %v867_v34 }
 0x242   :  { %970 = vst [vmem:[#allocation8 + $0x58] sm:$0xff] %v876_v61 }
 0x243   :  { %968 = vst [vmem:[#allocation8 + $0x48] sm:$0xff] %v868_v18 }
 0x248   :  { %v1169_v1 = vpop.f32.mrb[12].mxu1 }
 0x249   :  { %v889_v15 = vadd.f32 %v1169_v1, %v1745_v27  ;;  %v880_v63 = vpop.f32.mrb[13].mxu1 }
 0x24a   :  { %v881_v59 = vadd.f32 %v1745_v27, %v880_v63  ;;  %v1170_v42 = vpop.f32.mrb[14].mxu1 }
 0x24b   :  { %973 = vst [vmem:[#allocation8 + $0x70] sm:$0xff] %v889_v15  ;;  %v892_v29 = vadd.f32 %v1170_v42, %v1745_v27  ;;  %v883_v51 = vpop.f32.mrb[15].mxu1 }
 0x24c   :  { %971 = vst [vmem:[#allocation8 + $0x60] sm:$0xff] %v881_v59  ;;  %v884_v3 = vadd.f32 %v1745_v27, %v883_v51 }
 0x24d   :  { %974 = vst [vmem:[#allocation8 + $0x78] sm:$0xff] %v892_v29 }
 0x24e   :  { %972 = vst [vmem:[#allocation8 + $0x68] sm:$0xff] %v884_v3 }
 0x250   :  { %v1173_v53 = vpop.f32.mrb[16].mxu1 }
 0x251   :  { %v905_v23 = vadd.f32 %v1173_v53, %v1745_v27  ;;  %v896_v4 = vpop.f32.mrb[17].mxu1 }
 0x252   :  { %v897_v49 = vadd.f32 %v1745_v27, %v896_v4  ;;  %v1174_v35 = vpop.f32.mrb[18].mxu1 }
 0x253   :  { %977 = vst [vmem:[#allocation8 + $0x90] sm:$0xff] %v905_v23  ;;  %v908_v14 = vadd.f32 %v1174_v35, %v1745_v27  ;;  %v899_v7 = vpop.f32.mrb[19].mxu1 }
 0x254   :  { %975 = vst [vmem:[#allocation8 + $0x80] sm:$0xff] %v897_v49  ;;  %v900_v0 = vadd.f32 %v1745_v27, %v899_v7 }
 0x255   :  { %978 = vst [vmem:[#allocation8 + $0x98] sm:$0xff] %v908_v14 }
 0x256   :  { %976 = vst [vmem:[#allocation8 + $0x88] sm:$0xff] %v900_v0 }
 0x258   :  { %v1177_v10 = vpop.f32.mrb[20].mxu1 }
 0x259   :  { %v921_v24 = vadd.f32 %v1177_v10, %v1745_v27  ;;  %v912_v11 = vpop.f32.mrb[21].mxu1 }
 0x25a   :  { %v913_v26 = vadd.f32 %v1745_v27, %v912_v11  ;;  %v1178_v58 = vpop.f32.mrb[22].mxu1 }
 0x25b   :  { %981 = vst [vmem:[#allocation8 + $0xb0] sm:$0xff] %v921_v24  ;;  %v924_v12 = vadd.f32 %v1178_v58, %v1745_v27  ;;  %v915_v57 = vpop.f32.mrb[23].mxu1 }
 0x25c   :  { %979 = vst [vmem:[#allocation8 + $0xa0] sm:$0xff] %v913_v26  ;;  %v916_v8 = vadd.f32 %v1745_v27, %v915_v57 }
 0x25d   :  { %982 = vst [vmem:[#allocation8 + $0xb8] sm:$0xff] %v924_v12 }
 0x25e   :  { %980 = vst [vmem:[#allocation8 + $0xa8] sm:$0xff] %v916_v8 }
 0x260   :  { %v1181_v40 = vpop.f32.mrb[24].mxu1 }
 0x261   :  { %v937_v25 = vadd.f32 %v1181_v40, %v1745_v27  ;;  %v928_v9 = vpop.f32.mrb[25].mxu1 }
 0x262   :  { %v929_v5 = vadd.f32 %v1745_v27, %v928_v9  ;;  %v1182_v20 = vpop.f32.mrb[26].mxu1 }
 0x263   :  { %985 = vst [vmem:[#allocation8 + $0xd0] sm:$0xff] %v937_v25  ;;  %v940_v16 = vadd.f32 %v1182_v20, %v1745_v27  ;;  %v931_v19 = vpop.f32.mrb[27].mxu1 }
 0x264   :  { %983 = vst [vmem:[#allocation8 + $0xc0] sm:$0xff] %v929_v5  ;;  %v932_v30 = vadd.f32 %v1745_v27, %v931_v19 }
 0x265   :  { %986 = vst [vmem:[#allocation8 + $0xd8] sm:$0xff] %v940_v16 }
 0x266   :  { %984 = vst [vmem:[#allocation8 + $0xc8] sm:$0xff] %v932_v30 }
 0x268   :  { %v1185_v32 = vpop.f32.mrb[28].mxu1 }
 0x269   :  { %v953_v52 = vadd.f32 %v1185_v32, %v1745_v27  ;;  %v944_v36 = vpop.f32.mrb[29].mxu1 }
 0x26a   :  { %v945_v33 = vadd.f32 %v1745_v27, %v944_v36  ;;  %v1186_v50 = vpop.f32.mrb[30].mxu1 }
 0x26b   :  { %989 = vst [vmem:[#allocation8 + $0xf0] sm:$0xff] %v953_v52  ;;  %v956_v37 = vadd.f32 %v1186_v50, %v1745_v27  ;;  %v947_v38 = vpop.f32.mrb[31].mxu1 }
 0x26c   :  { %987 = vst [vmem:[#allocation8 + $0xe0] sm:$0xff] %v945_v33  ;;  %v948_v41 = vadd.f32 %v1745_v27, %v947_v38 }
 0x26d   :  { %990 = vst [vmem:[#allocation8 + $0xf8] sm:$0xff] %v956_v37 }
 0x26e   :  { %988 = vst [vmem:[#allocation8 + $0xe8] sm:$0xff] %v948_v41 }
 0x26f   :  { %1368 = shalt.err (!%p1365_p0)
}
 0x270   :  { %s1369_s10 = scalar_lea.hbm %s1796_s5, 4096 }
 0x271   :  { %p1370_p1 = scmp.ne.s32.totalorder %s1796_s5, %s1369_s10  ;;  %p1373_p2 = scmp.lt.u32.totalorder %s1369_s10, %s1796_s5 }
 0x273   :  { %p1375_p3 = pnand %p1373_p2, %p1370_p1 }
 0x275   :  { %1378 = shalt.err (!%p1375_p3)
}
 0x276   :  { %s1391_s15 = smov 128   ;;  %s1392_s16 = smov 8  }
 0x277   :  { %1002 = dma.vmem_to_hbm [thread:$0]  %s997_s6, 4096, %s1796_s5, [#allocation4], %s1391_s15, %s1391_s15, %s1392_s16  }
 0x278   :  { %1383 = dma.done.wait [#allocation4], 4096  }
 0x279   :  { %1384 = vsyncadd [#allocation4], 4294963200 }
 0x27a   :  { %1006 = vsyncpa [#allocation3], 1 }
 0x27b   :  { %1007 = vsyncpa [#allocation6], 1 }
 0x27c   :  { %1008 = vsyncpa [#allocation4], 1 }

</bundles_post_ra>
